<compile_context>
chip_gen: v5e
topology: v5e:2x2
jax: 0.10.0
libtpu: 0.0.40
codegen_flags: <defaults>
</compile_context>

<pallas_src>
import jax
import jax.numpy as jnp
from jax import lax
from jax.experimental import pallas as pl
from jax.experimental.pallas import tpu as pltpu

BN_EPS = 1e-5


def _round8(n):
    return (n + 7) // 8 * 8


def _pack_layout(C, T, OUT):
    """Row offsets of each folded weight inside the single packed weight operand."""
    segs = {}
    off = 0

    def add(name, rows, cols):
        nonlocal off
        segs[name] = (off, rows, cols)
        off += _round8(rows)

    add("wq1", C, T)          # query_project conv1 (C -> T)
    add("wq2", T, T)          # query_project conv2 (T -> T), T**-0.5 folded in
    add("wkv", C, 2 * T)      # [key_project conv1 | value_project] fused (C -> 2T)
    add("wk2", T, T)          # key_project conv2 (T -> T)
    add("wo", T, C)           # out_project (T -> C)
    add("wc0", 6 * C, OUT)    # bottleneck 3x3 conv, dy=0, dx taps concatenated along K
    add("wc1", 6 * C, OUT)    # dy=1
    add("wc2", 6 * C, OUT)    # dy=2
    pcols = max(2 * T, C, OUT)
    return segs, off, pcols


# ---------------------------------------------------------------------------
# Fused kernel: attention (1x1 projections + scaled softmax) -> concat ->
#               3x3 conv + folded BN + ReLU, per batch element, all in vregs.
# ---------------------------------------------------------------------------
def fused_forward_pallas(feats_hwc, mem2d, wpack, bpack, *, B, C, H, W, T, OUT,
                         compute_dtype=jnp.float32):
    HW = H * W
    segs, _, _ = _pack_layout(C, T, OUT)
    cd = compute_dtype
    f32 = jnp.float32

    def kernel(x_ref, mem_ref, w_ref, b_ref, out_ref):
        relu = lambda z: jnp.maximum(z, 0.0)

        def wsl(name):                                  # static ref slice of the weight pack
            off, r, c = segs[name]
            return w_ref[off:off + r, :c]

        def bsl(row, width):                            # static ref slice of the bias pack
            return b_ref[row:row + 1, :width]

        x_cd = x_ref[...].astype(cd)                    # (HW, C), single cast of the features

        # ---- attention ---------------------------------------------------
        # query_project: conv1x1 + folded BN + ReLU, twice (T**-0.5 folded into stage 2).
        q = relu(jnp.dot(x_cd, wsl("wq1"), preferred_element_type=f32) + bsl(0, T))
        q = relu(jnp.dot(q.astype(cd), wsl("wq2"), preferred_element_type=f32) + bsl(1, T))

        # key / value projections of the (batch-independent) memory; first stages fused.
        m_cd = mem_ref[...].astype(cd)                                          # (NC, C)
        kv = relu(jnp.dot(m_cd, wsl("wkv"), preferred_element_type=f32) + bsl(2, 2 * T))
        k = relu(jnp.dot(kv[:, :T].astype(cd), wsl("wk2"),
                         preferred_element_type=f32) + bsl(3, T))               # (NC, T)
        v = kv[:, T:]                                                           # (NC, T)

        # sim = Q . K (contract last axes, no materialized transpose); softmax over classes.
        sim = lax.dot_general(q.astype(cd), k.astype(cd),
                              dimension_numbers=(((1,), (1,)), ((), ())),
                              preferred_element_type=f32)                       # (HW, NC)
        sim = sim - jnp.max(sim, axis=-1, keepdims=True)
        p = jnp.exp(sim)
        p = p * pl.reciprocal(jnp.sum(p, axis=-1, keepdims=True), approx=True)

        ctx = jnp.dot(p.astype(cd), v.astype(cd), preferred_element_type=f32)   # (HW, T)
        ctx = relu(jnp.dot(ctx.astype(cd), wsl("wo"),
                           preferred_element_type=f32) + bsl(4, C))             # (HW, C)

        # ---- concat + 3x3 conv as 3 wide (K = 3*2C) matmuls ---------------
        # z = [feats | context]  (torch.cat order), in compute dtype for the MXU.
        z = jnp.concatenate([x_cd, ctx.astype(cd)], axis=-1)                    # (HW, 2C)

        # Mask pixels that would wrap across an image row when shifted by +-1 along flat HW.
        col = lax.broadcasted_iota(jnp.int32, (HW, 1), 0) % W
        zeros_z = jnp.zeros_like(z)
        z_as_left = jnp.where(col != (W - 1), z, zeros_z)    # valid as a LEFT neighbour (dx=0)
        z_as_right = jnp.where(col != 0, z, zeros_z)         # valid as a RIGHT neighbour (dx=2)

        # band(vals, lead)[r] = vals[r - lead] (zero outside): zero-extended shifted copies.
        def band(vals, lead):
            lo = jnp.zeros((lead, 2 * C), cd)
            hi = jnp.zeros((2 * W - lead, 2 * C), cd)
            return jnp.concatenate([lo, vals, hi], axis=0)                      # (HW + 2W, 2C)

        big = jnp.concatenate([band(z_as_left, W + 1),      # dx = 0 taps
                               band(z, W),                  # dx = 1 taps
                               band(z_as_right, W - 1)],    # dx = 2 taps
                              axis=-1)                                          # (HW + 2W, 6C)

        # dy windows are 8-aligned row slices (W multiple of 8 at these shapes); every window
        # row is a valid output pixel -> zero wasted conv rows, no acc scratch, no copy-out loop.
        acc = jnp.dot(big[0:HW], wsl("wc0"), preferred_element_type=f32)
        acc = acc + jnp.dot(big[W:W + HW], wsl("wc1"), preferred_element_type=f32)
        acc = acc + jnp.dot(big[2 * W:2 * W + HW], wsl("wc2"), preferred_element_type=f32)

        out_ref[...] = relu(acc + bsl(5, OUT))                                  # (HW, OUT) f32

    full2d = lambda arr: pl.BlockSpec(arr.shape, lambda b: (0, 0))
    return pl.pallas_call(
        kernel,
        out_shape=jax.ShapeDtypeStruct((B, HW, OUT), jnp.float32),
        grid=(B,),
        in_specs=[
            pl.BlockSpec((None, HW, C), lambda b: (b, 0, 0)),   # per-batch feats block
            full2d(mem2d),                                      # memory (replicated, 1 DMA)
            full2d(wpack),                                      # packed weights (1 DMA)
            full2d(bpack),                                      # packed biases  (1 DMA)
        ],
        out_specs=pl.BlockSpec((None, HW, OUT), lambda b: (b, 0, 0)),
        compiler_params=pltpu.CompilerParams(
            dimension_semantics=("parallel",),          # megacore-shard the batch axis on v7x
            vmem_limit_bytes=32 * 1024 * 1024,          # explicit budget (actual use << this)
        ),
    )(feats_hwc, mem2d, wpack, bpack)


# ---------------------------------------------------------------------------
# Full forward (num_feats_per_cls == 1 path of FeaturesMemoryDomain.forward)
# ---------------------------------------------------------------------------
def features_memory_domain_forward(feats_nchw, memory_source, memory_target, kparams,
                                   domain="SOURCE", compute_dtype=jnp.float32, *,
                                   transform_channels, out_channels):
    B, C, H, W = feats_nchw.shape
    memory_domain = memory_target if domain == "TARGET" else memory_source
    mem2d = memory_domain[:, 0, :]                                   # (num_classes, C)
    # NCHW -> (B, HW, C): feeds the input DMA directly (hidden behind the pipeline).
    feats_hwc = feats_nchw.reshape(B, C, H * W).transpose(0, 2, 1)
    out = fused_forward_pallas(feats_hwc, mem2d, kparams["wpack"], kparams["bpack"],
                               B=B, C=C, H=H, W=W, T=transform_channels, OUT=out_channels,
                               compute_dtype=compute_dtype)          # (B, HW, OUT)
    memory_output = out.reshape(B, H, W, out_channels).transpose(0, 3, 1, 2)   # NCHW
    return memory_source, memory_target, memory_output


# ---------------------------------------------------------------------------
# Parameters: raw conv weights + eval-mode BN running stats; prepare_kernel_params folds BN,
# the attention scale and the tap/kv fusions, and packs everything into two operands.
# ---------------------------------------------------------------------------
def init_params(key, C, T, OUT):
    keys = iter(jax.random.split(key, 40))

    def rand(shape, scale=0.1):
        return jax.random.normal(next(keys), shape, jnp.float32) * scale

    def bn_params(n):
        return {
            "gamma": 1.0 + 0.1 * jax.random.normal(next(keys), (n,), jnp.float32),
            "beta": 0.1 * jax.random.normal(next(keys), (n,), jnp.float32),
            "mean": 0.1 * jax.random.normal(next(keys), (n,), jnp.float32),
            "var": (1.0 + 0.1 * jax.random.normal(next(keys), (n,), jnp.float32)) ** 2,
        }

    def proj(cin, cout):
        return {"w": rand((cin, cout)), "bn": bn_params(cout)}

    return {
        "q1": proj(C, T), "q2": proj(T, T),          # query_project
        "k1": proj(C, T), "k2": proj(T, T),          # key_project
        "v": proj(C, T),                             # value_project
        "o": proj(T, C),                             # out_project
        "bneck": {"w": rand((3, 3, 2 * C, OUT)), "bn": bn_params(OUT)},   # 3x3 bottleneck
    }


def _fold_bn(w, bn):
    """Fold eval-mode BatchNorm running stats into (W, bias) for a bias-free conv."""
    s = bn["gamma"] / jnp.sqrt(bn["var"] + BN_EPS)
    return w * s, bn["beta"] - bn["mean"] * s


def prepare_kernel_params(params, compute_dtype=jnp.float32):
    C, T = params["q1"]["w"].shape
    OUT = params["bneck"]["w"].shape[-1]
    scale = float(T) ** -0.5

    wq1, bq1 = _fold_bn(params["q1"]["w"], params["q1"]["bn"])
    wq2, bq2 = _fold_bn(params["q2"]["w"], params["q2"]["bn"])
    wq2, bq2 = wq2 * scale, bq2 * scale                      # exact: ReLU is positive-homogeneous
    wk1, bk1 = _fold_bn(params["k1"]["w"], params["k1"]["bn"])
    wk2, bk2 = _fold_bn(params["k2"]["w"], params["k2"]["bn"])
    wv, bv = _fold_bn(params["v"]["w"], params["v"]["bn"])
    wo, bo = _fold_bn(params["o"]["w"], params["o"]["bn"])
    wkv = jnp.concatenate([wk1, wv], axis=1)                 # (C, 2T) fused K/V first stage
    bkv = jnp.concatenate([bk1, bv], axis=0)                 # (2T,)

    # 3x3 bottleneck conv: fold BN, then concat the 3 dx taps along the contraction axis per dy.
    # NOTE for real PyTorch checkpoints: Conv2d weights are OIHW -> permute to (kh, kw, cin, cout)
    # first, and the cin axis must keep torch.cat([feats, context], dim=1) order (feats first).
    wb, bcv = _fold_bn(params["bneck"]["w"], params["bneck"]["bn"])       # (3,3,2C,OUT), (OUT,)
    wc = [jnp.concatenate([wb[dy, 0], wb[dy, 1], wb[dy, 2]], axis=0) for dy in range(3)]

    segs, rows, pcols = _pack_layout(C, T, OUT)
    wpack = jnp.zeros((rows, pcols), jnp.float32)
    for name, mat in (("wq1", wq1), ("wq2", wq2), ("wkv", wkv), ("wk2", wk2), ("wo", wo),
                      ("wc0", wc[0]), ("wc1", wc[1]), ("wc2", wc[2])):
        off, r, c = segs[name]
        wpack = wpack.at[off:off + r, :c].set(mat)

    bpack = jnp.zeros((8, pcols), jnp.float32)
    for row, vec in ((0, bq1), (1, bq2), (2, bkv), (3, bk2), (4, bo), (5, bcv)):
        bpack = bpack.at[row, :vec.shape[0]].set(vec)

    return {"wpack": wpack.astype(compute_dtype), "bpack": bpack}


# ---------------------------------------------------------------------------
# Pure-JAX reference (faithful to the module math; explicit BN, explicit scale, no folding)
# ---------------------------------------------------------------------------
def _bn_ref(y, bn):
    return (y - bn["mean"]) * (bn["gamma"] / jnp.sqrt(bn["var"] + BN_EPS)) + bn["beta"]


def reference_forward(feats, memory_source, memory_target, params, domain="SOURCE"):
    B, C, H, W = feats.shape
    mem = memory_target if domain == "TARGET" else memory_source
    m = mem[:, 0, :]
    x = feats.reshape(B, C, H * W).transpose(0, 2, 1)            # (B, HW, C)
    relu = lambda z: jnp.maximum(z, 0.0)
    proj = lambda z, pp: relu(_bn_ref(jnp.dot(z, pp["w"], precision="highest"), pp["bn"]))

    q = proj(proj(x, params["q1"]), params["q2"])                # (B, HW, T)
    k = proj(proj(m, params["k1"]), params["k2"])                # (NC, T)
    v = proj(m, params["v"])                                     # (NC, T)
    T = params["q1"]["w"].shape[1]
    sim = jnp.einsum("bqt,kt->bqk", q, k, precision="highest") * (T ** -0.5)
    sim = jax.nn.softmax(sim, axis=-1)
    ctx = jnp.einsum("bqk,kt->bqt", sim, v, precision="highest")
    ctx = proj(ctx, params["o"])                                 # (B, HW, C)

    z = jnp.concatenate([x.reshape(B, H, W, C), ctx.reshape(B, H, W, C)], axis=-1)
    zp = jnp.pad(z, ((0, 0), (1, 1), (1, 1), (0, 0)))
    wb = params["bneck"]["w"]
    acc = jnp.zeros((B, H, W, wb.shape[-1]), jnp.float32)
    for dy in range(3):
        for dx in range(3):
            acc = acc + jnp.einsum("bhwc,co->bhwo", zp[:, dy:dy + H, dx:dx + W, :],
                                   wb[dy, dx], precision="highest")
    out = relu(_bn_ref(acc, params["bneck"]["bn"]))
    return out.transpose(0, 3, 1, 2)


if __name__ == "__main__":
    # Small shapes consistent with the module (num_feats_per_cls=1 path).
    B, C, H, W = 2, 32, 8, 8           # feats_channels = 32
    NUM_CLASSES, T, OUT = 8, 16, 32    # transform_channels = 16, out_channels = 32

    key = jax.random.PRNGKey(0)
    k_feat, k_mem_s, k_mem_t, k_params = jax.random.split(key, 4)
    feats = jax.random.normal(k_feat, (B, C, H, W), jnp.float32)
    memory_source = jax.random.normal(k_mem_s, (NUM_CLASSES, 1, C), jnp.float32)
    memory_target = jax.random.normal(k_mem_t, (NUM_CLASSES, 1, C), jnp.float32)
    params = init_params(k_params, C, T, OUT)

    fwd = jax.jit(features_memory_domain_forward,
                  static_argnames=("domain", "compute_dtype",
                                   "transform_channels", "out_channels"))

    ref = reference_forward(feats, memory_source, memory_target, params, domain="SOURCE")

    # f32 matmul-operand path: strict check against the pure-JAX reference.
    kp32 = prepare_kernel_params(params, jnp.float32)
    _, _, out_f32 = fwd(feats, memory_source, memory_target, kp32, domain="SOURCE",
                        compute_dtype=jnp.float32, transform_channels=T, out_channels=OUT)
    jax.block_until_ready(out_f32)
    assert out_f32.shape == (B, OUT, H, W)
    assert bool(jnp.all(jnp.isfinite(out_f32)))
    assert bool(jnp.allclose(out_f32, ref, atol=1e-2, rtol=1e-2)), \
        "Pallas f32 output mismatch vs JAX reference"

    # bf16 matmul-operand path (recommended on v6e/v7x; keep f32 on v5e): softmax / bias adds /
    # accumulation stay f32; loose tolerance covers bf16 operand rounding.
    kpbf = prepare_kernel_params(params, jnp.bfloat16)
    _, _, out_bf16 = fwd(feats, memory_source, memory_target, kpbf, domain="SOURCE",
                         compute_dtype=jnp.bfloat16, transform_channels=T, out_channels=OUT)
    jax.block_until_ready(out_bf16)
    assert bool(jnp.all(jnp.isfinite(out_bf16)))
    assert bool(jnp.allclose(out_bf16, ref, atol=1e-1, rtol=1e-1)), \
        "Pallas bf16 output mismatch vs JAX reference"

    # TODO(synk): update_source/update_target (data-dependent per-class EMA memory updates +
    # dist.all_reduce) are training-time host logic and are not part of the forward kernel.
    print("KERNEL_OK")
</pallas_src>

<mosaic_0001>
module attributes {stable_mosaic.version = 11 : i64} {
  func.func @kernel(%arg0: i32, %arg1: memref<1x64x32xf32, #tpu.memory_space<vmem>>, %arg2: memref<8x32xf32, #tpu.memory_space<vmem>>, %arg3: memref<688x32xf32, #tpu.memory_space<vmem>>, %arg4: memref<8x32xf32, #tpu.memory_space<vmem>>, %arg5: memref<1x64x32xf32, #tpu.memory_space<vmem>>) attributes {dimension_semantics = [#tpu.dimension_semantics<parallel>], iteration_bounds = array<i64: 2>, scalar_prefetch = 0 : i64, scratch_operands = 0 : i64, tpu.core_type = #tpu.core_type<tc>, window_params = [{transform_indices = @transform_0, window_bounds = array<i64: 1, 64, 32>}, {pipeline_mode = #tpu.pipeline_mode<synchronous>, transform_indices = @transform_1, window_bounds = array<i64: 8, 32>}, {pipeline_mode = #tpu.pipeline_mode<synchronous>, transform_indices = @transform_2, window_bounds = array<i64: 688, 32>}, {pipeline_mode = #tpu.pipeline_mode<synchronous>, transform_indices = @transform_3, window_bounds = array<i64: 8, 32>}, {transform_indices = @transform_4, window_bounds = array<i64: 1, 64, 32>}]} {
    %c0 = arith.constant 0 : index
    %c0_0 = arith.constant 0 : index
    %c0_1 = arith.constant 0 : index
    %0 = vector.load %arg1[%c0, %c0_0, %c0_1] : memref<1x64x32xf32, #tpu.memory_space<vmem>>, vector<1x64x32xf32>
    %1 = vector.shape_cast %0 : vector<1x64x32xf32> to vector<64x32xf32>
    %c0_2 = arith.constant 0 : index
    %c0_3 = arith.constant 0 : index
    %2 = vector.load %arg3[%c0_2, %c0_3] : memref<688x32xf32, #tpu.memory_space<vmem>>, vector<32x16xf32>
    %cst = arith.constant dense<0.000000e+00> : vector<64x16xf32>
    %3 = tpu.matmul %1, %2, %cst {dimension_numbers = #tpu.dot_dimension_numbers<[1], [0], [0], [1], [0, 0, 1, 1], [], []>} : vector<64x32xf32>, vector<32x16xf32>, vector<64x16xf32> -> vector<64x16xf32>
    %c0_4 = arith.constant 0 : index
    %c0_5 = arith.constant 0 : index
    %4 = vector.load %arg4[%c0_4, %c0_5] : memref<8x32xf32, #tpu.memory_space<vmem>>, vector<1x16xf32>
    %5 = vector.broadcast %4 : vector<1x16xf32> to vector<64x16xf32>
    %6 = arith.addf %3, %5 : vector<64x16xf32>
    %cst_6 = arith.constant 0.000000e+00 : f32
    %7 = vector.broadcast %cst_6 : f32 to vector<64x16xf32>
    %8 = arith.maximumf %6, %7 : vector<64x16xf32>
    %c32 = arith.constant 32 : index
    %c0_7 = arith.constant 0 : index
    %9 = vector.load %arg3[%c32, %c0_7] : memref<688x32xf32, #tpu.memory_space<vmem>>, vector<16x16xf32>
    %cst_8 = arith.constant dense<0.000000e+00> : vector<64x16xf32>
    %10 = tpu.matmul %8, %9, %cst_8 {dimension_numbers = #tpu.dot_dimension_numbers<[1], [0], [0], [1], [0, 0, 1, 1], [], []>} : vector<64x16xf32>, vector<16x16xf32>, vector<64x16xf32> -> vector<64x16xf32>
    %c1 = arith.constant 1 : index
    %c0_9 = arith.constant 0 : index
    %11 = vector.load %arg4[%c1, %c0_9] : memref<8x32xf32, #tpu.memory_space<vmem>>, vector<1x16xf32>
    %12 = vector.broadcast %11 : vector<1x16xf32> to vector<64x16xf32>
    %13 = arith.addf %10, %12 : vector<64x16xf32>
    %cst_10 = arith.constant 0.000000e+00 : f32
    %14 = vector.broadcast %cst_10 : f32 to vector<64x16xf32>
    %15 = arith.maximumf %13, %14 : vector<64x16xf32>
    %c0_11 = arith.constant 0 : index
    %c0_12 = arith.constant 0 : index
    %16 = vector.load %arg2[%c0_11, %c0_12] : memref<8x32xf32, #tpu.memory_space<vmem>>, vector<8x32xf32>
    %c48 = arith.constant 48 : index
    %c0_13 = arith.constant 0 : index
    %17 = vector.load %arg3[%c48, %c0_13] : memref<688x32xf32, #tpu.memory_space<vmem>>, vector<32x32xf32>
    %cst_14 = arith.constant dense<0.000000e+00> : vector<8x32xf32>
    %18 = tpu.matmul %16, %17, %cst_14 {dimension_numbers = #tpu.dot_dimension_numbers<[1], [0], [0], [1], [0, 0, 1, 1], [], []>} : vector<8x32xf32>, vector<32x32xf32>, vector<8x32xf32> -> vector<8x32xf32>
    %c2 = arith.constant 2 : index
    %c0_15 = arith.constant 0 : index
    %19 = vector.load %arg4[%c2, %c0_15] : memref<8x32xf32, #tpu.memory_space<vmem>>, vector<1x32xf32>
    %20 = vector.broadcast %19 : vector<1x32xf32> to vector<8x32xf32>
    %21 = arith.addf %18, %20 : vector<8x32xf32>
    %cst_16 = arith.constant 0.000000e+00 : f32
    %22 = vector.broadcast %cst_16 : f32 to vector<8x32xf32>
    %23 = arith.maximumf %21, %22 : vector<8x32xf32>
    %24 = vector.extract_strided_slice %23 {offsets = [0, 0], sizes = [8, 16], strides = [1, 1]} : vector<8x32xf32> to vector<8x16xf32>
    %c80 = arith.constant 80 : index
    %c0_17 = arith.constant 0 : index
    %25 = vector.load %arg3[%c80, %c0_17] : memref<688x32xf32, #tpu.memory_space<vmem>>, vector<16x16xf32>
    %cst_18 = arith.constant dense<0.000000e+00> : vector<8x16xf32>
    %26 = tpu.matmul %24, %25, %cst_18 {dimension_numbers = #tpu.dot_dimension_numbers<[1], [0], [0], [1], [0, 0, 1, 1], [], []>} : vector<8x16xf32>, vector<16x16xf32>, vector<8x16xf32> -> vector<8x16xf32>
    %c3 = arith.constant 3 : index
    %c0_19 = arith.constant 0 : index
    %27 = vector.load %arg4[%c3, %c0_19] : memref<8x32xf32, #tpu.memory_space<vmem>>, vector<1x16xf32>
    %28 = vector.broadcast %27 : vector<1x16xf32> to vector<8x16xf32>
    %29 = arith.addf %26, %28 : vector<8x16xf32>
    %cst_20 = arith.constant 0.000000e+00 : f32
    %30 = vector.broadcast %cst_20 : f32 to vector<8x16xf32>
    %31 = arith.maximumf %29, %30 : vector<8x16xf32>
    %32 = vector.extract_strided_slice %23 {offsets = [0, 16], sizes = [8, 16], strides = [1, 1]} : vector<8x32xf32> to vector<8x16xf32>
    %cst_21 = arith.constant dense<0.000000e+00> : vector<64x8xf32>
    %33 = tpu.matmul %15, %31, %cst_21 {dimension_numbers = #tpu.dot_dimension_numbers<[1], [1], [0], [0], [0, 0, 1, 0], [], []>} : vector<64x16xf32>, vector<8x16xf32>, vector<64x8xf32> -> vector<64x8xf32>
    %cst_22 = arith.constant dense<0xFF800000> : vector<64xf32>
    %34 = vector.multi_reduction <maximumf>, %33, %cst_22 [1] : vector<64x8xf32> to vector<64xf32>
    %35 = vector.shape_cast %34 : vector<64xf32> to vector<64x1xf32>
    %36 = vector.broadcast %35 : vector<64x1xf32> to vector<64x8xf32>
    %37 = arith.subf %33, %36 : vector<64x8xf32>
    %38 = math.exp %37 : vector<64x8xf32>
    %cst_23 = arith.constant dense<0.000000e+00> : vector<64xf32>
    %39 = vector.multi_reduction <add>, %38, %cst_23 [1] : vector<64x8xf32> to vector<64xf32>
    %40 = vector.shape_cast %39 : vector<64xf32> to vector<64x1xf32>
    %41 = tpu.reciprocal %40 {approx = true} : vector<64x1xf32> -> vector<64x1xf32>
    %42 = vector.broadcast %41 : vector<64x1xf32> to vector<64x8xf32>
    %43 = arith.mulf %38, %42 : vector<64x8xf32>
    %cst_24 = arith.constant dense<0.000000e+00> : vector<64x16xf32>
    %44 = tpu.matmul %43, %32, %cst_24 {dimension_numbers = #tpu.dot_dimension_numbers<[1], [0], [0], [1], [0, 0, 1, 1], [], []>} : vector<64x8xf32>, vector<8x16xf32>, vector<64x16xf32> -> vector<64x16xf32>
    %c96 = arith.constant 96 : index
    %c0_25 = arith.constant 0 : index
    %45 = vector.load %arg3[%c96, %c0_25] : memref<688x32xf32, #tpu.memory_space<vmem>>, vector<16x32xf32>
    %cst_26 = arith.constant dense<0.000000e+00> : vector<64x32xf32>
    %46 = tpu.matmul %44, %45, %cst_26 {dimension_numbers = #tpu.dot_dimension_numbers<[1], [0], [0], [1], [0, 0, 1, 1], [], []>} : vector<64x16xf32>, vector<16x32xf32>, vector<64x32xf32> -> vector<64x32xf32>
    %c4 = arith.constant 4 : index
    %c0_27 = arith.constant 0 : index
    %47 = vector.load %arg4[%c4, %c0_27] : memref<8x32xf32, #tpu.memory_space<vmem>>, vector<1x32xf32>
    %48 = vector.broadcast %47 : vector<1x32xf32> to vector<64x32xf32>
    %49 = arith.addf %46, %48 : vector<64x32xf32>
    %cst_28 = arith.constant 0.000000e+00 : f32
    %50 = vector.broadcast %cst_28 : f32 to vector<64x32xf32>
    %51 = arith.maximumf %49, %50 : vector<64x32xf32>
    %52 = tpu.concatenate %1, %51 in 1 : vector<64x32xf32>, vector<64x32xf32> -> vector<64x64xf32>
    %53 = tpu.iota {dimensions = array<i32: 0>} : vector<64x1xi32>
    %c8_i32 = arith.constant 8 : i32
    %c0_i32 = arith.constant 0 : i32
    %54 = arith.cmpi eq, %c8_i32, %c0_i32 : i32
    %c1_i32 = arith.constant 1 : i32
    %55 = arith.select %54, %c1_i32, %c8_i32 : i32
    %56 = vector.broadcast %55 : i32 to vector<64x1xi32>
    %57 = arith.remsi %53, %56 : vector<64x1xi32>
    %c0_i32_29 = arith.constant 0 : i32
    %58 = vector.broadcast %c0_i32_29 : i32 to vector<64x1xi32>
    %59 = arith.cmpi ne, %57, %58 : vector<64x1xi32>
    %c0_i32_30 = arith.constant 0 : i32
    %60 = vector.broadcast %c0_i32_30 : i32 to vector<64x1xi32>
    %61 = arith.cmpi slt, %57, %60 : vector<64x1xi32>
    %c0_i32_31 = arith.constant 0 : i32
    %62 = arith.cmpi slt, %55, %c0_i32_31 : i32
    %63 = vector.broadcast %62 : i1 to vector<64x1xi1>
    %64 = vector.broadcast %63 : vector<64x1xi1> to vector<64x1xi1>
    %65 = arith.xori %61, %64 : vector<64x1xi1>
    %66 = arith.andi %65, %59 : vector<64x1xi1>
    %67 = vector.broadcast %55 : i32 to vector<64x1xi32>
    %68 = arith.addi %57, %67 : vector<64x1xi32>
    %69 = arith.select %66, %68, %57 : vector<64x1xi1>, vector<64x1xi32>
    %cst_32 = arith.constant 0.000000e+00 : f32
    %70 = vector.broadcast %cst_32 : f32 to vector<64x64xf32>
    %c7_i32 = arith.constant 7 : i32
    %71 = vector.broadcast %c7_i32 : i32 to vector<64x1xi32>
    %72 = arith.cmpi ne, %69, %71 : vector<64x1xi32>
    %73 = vector.shape_cast %72 : vector<64x1xi1> to vector<64x1xi1>
    %74 = vector.broadcast %73 : vector<64x1xi1> to vector<64x64xi1>
    %75 = arith.select %74, %52, %70 : vector<64x64xi1>, vector<64x64xf32>
    %c0_i32_33 = arith.constant 0 : i32
    %76 = vector.broadcast %c0_i32_33 : i32 to vector<64x1xi32>
    %77 = arith.cmpi ne, %69, %76 : vector<64x1xi32>
    %78 = vector.shape_cast %77 : vector<64x1xi1> to vector<64x1xi1>
    %79 = vector.broadcast %78 : vector<64x1xi1> to vector<64x64xi1>
    %80 = arith.select %79, %52, %70 : vector<64x64xi1>, vector<64x64xf32>
    %cst_34 = arith.constant 0.000000e+00 : f32
    %81 = vector.broadcast %cst_34 : f32 to vector<9x64xf32>
    %cst_35 = arith.constant 0.000000e+00 : f32
    %82 = vector.broadcast %cst_35 : f32 to vector<7x64xf32>
    %83 = tpu.concatenate %81, %75, %82 in 0 : vector<9x64xf32>, vector<64x64xf32>, vector<7x64xf32> -> vector<80x64xf32>
    %cst_36 = arith.constant 0.000000e+00 : f32
    %84 = vector.broadcast %cst_36 : f32 to vector<8x64xf32>
    %cst_37 = arith.constant 0.000000e+00 : f32
    %85 = vector.broadcast %cst_37 : f32 to vector<8x64xf32>
    %86 = tpu.concatenate %84, %52, %85 in 0 : vector<8x64xf32>, vector<64x64xf32>, vector<8x64xf32> -> vector<80x64xf32>
    %cst_38 = arith.constant 0.000000e+00 : f32
    %87 = vector.broadcast %cst_38 : f32 to vector<7x64xf32>
    %cst_39 = arith.constant 0.000000e+00 : f32
    %88 = vector.broadcast %cst_39 : f32 to vector<9x64xf32>
    %89 = tpu.concatenate %87, %80, %88 in 0 : vector<7x64xf32>, vector<64x64xf32>, vector<9x64xf32> -> vector<80x64xf32>
    %90 = tpu.concatenate %83, %86, %89 in 1 : vector<80x64xf32>, vector<80x64xf32>, vector<80x64xf32> -> vector<80x192xf32>
    %91 = vector.extract_strided_slice %90 {offsets = [0, 0], sizes = [64, 192], strides = [1, 1]} : vector<80x192xf32> to vector<64x192xf32>
    %c112 = arith.constant 112 : index
    %c0_40 = arith.constant 0 : index
    %92 = vector.load %arg3[%c112, %c0_40] : memref<688x32xf32, #tpu.memory_space<vmem>>, vector<192x32xf32>
    %cst_41 = arith.constant dense<0.000000e+00> : vector<64x32xf32>
    %93 = tpu.matmul %91, %92, %cst_41 {dimension_numbers = #tpu.dot_dimension_numbers<[1], [0], [0], [1], [0, 0, 1, 1], [], []>} : vector<64x192xf32>, vector<192x32xf32>, vector<64x32xf32> -> vector<64x32xf32>
    %94 = vector.extract_strided_slice %90 {offsets = [8, 0], sizes = [64, 192], strides = [1, 1]} : vector<80x192xf32> to vector<64x192xf32>
    %c304 = arith.constant 304 : index
    %c0_42 = arith.constant 0 : index
    %95 = vector.load %arg3[%c304, %c0_42] : memref<688x32xf32, #tpu.memory_space<vmem>>, vector<192x32xf32>
    %cst_43 = arith.constant dense<0.000000e+00> : vector<64x32xf32>
    %96 = tpu.matmul %94, %95, %cst_43 {dimension_numbers = #tpu.dot_dimension_numbers<[1], [0], [0], [1], [0, 0, 1, 1], [], []>} : vector<64x192xf32>, vector<192x32xf32>, vector<64x32xf32> -> vector<64x32xf32>
    %97 = arith.addf %93, %96 : vector<64x32xf32>
    %98 = vector.extract_strided_slice %90 {offsets = [16, 0], sizes = [64, 192], strides = [1, 1]} : vector<80x192xf32> to vector<64x192xf32>
    %c496 = arith.constant 496 : index
    %c0_44 = arith.constant 0 : index
    %99 = vector.load %arg3[%c496, %c0_44] : memref<688x32xf32, #tpu.memory_space<vmem>>, vector<192x32xf32>
    %cst_45 = arith.constant dense<0.000000e+00> : vector<64x32xf32>
    %100 = tpu.matmul %98, %99, %cst_45 {dimension_numbers = #tpu.dot_dimension_numbers<[1], [0], [0], [1], [0, 0, 1, 1], [], []>} : vector<64x192xf32>, vector<192x32xf32>, vector<64x32xf32> -> vector<64x32xf32>
    %101 = arith.addf %97, %100 : vector<64x32xf32>
    %c5 = arith.constant 5 : index
    %c0_46 = arith.constant 0 : index
    %102 = vector.load %arg4[%c5, %c0_46] : memref<8x32xf32, #tpu.memory_space<vmem>>, vector<1x32xf32>
    %103 = vector.broadcast %102 : vector<1x32xf32> to vector<64x32xf32>
    %104 = arith.addf %101, %103 : vector<64x32xf32>
    %cst_47 = arith.constant 0.000000e+00 : f32
    %105 = vector.broadcast %cst_47 : f32 to vector<64x32xf32>
    %106 = arith.maximumf %104, %105 : vector<64x32xf32>
    %c0_48 = arith.constant 0 : index
    %c0_49 = arith.constant 0 : index
    %c0_50 = arith.constant 0 : index
    %107 = vector.load %arg5[%c0_48, %c0_49, %c0_50] : memref<1x64x32xf32, #tpu.memory_space<vmem>>, vector<1x64x32xf32>
    %108 = vector.shape_cast %107 : vector<1x64x32xf32> to vector<64x32xf32>
    %109 = vector.shape_cast %106 : vector<64x32xf32> to vector<1x64x32xf32>
    tpu.vector_store %arg5[%c0_48, %c0_49, %c0_50], %109 {strides = array<i32>} : memref<1x64x32xf32, #tpu.memory_space<vmem>>, vector<1x64x32xf32>,
    return
  }
  func.func @transform_0(%arg0: i32) -> (i32, i32, i32) {
    %c0_i32 = arith.constant 0 : i32
    %c0_i32_0 = arith.constant 0 : i32
    %c0_i32_1 = arith.constant 0 : i32
    return %arg0, %c0_i32, %c0_i32_0 : i32, i32, i32
  }
  func.func @transform_1(%arg0: i32) -> (i32, i32) {
    %c0_i32 = arith.constant 0 : i32
    %c0_i32_0 = arith.constant 0 : i32
    %c0_i32_1 = arith.constant 0 : i32
    return %c0_i32, %c0_i32_0 : i32, i32
  }
  func.func @transform_2(%arg0: i32) -> (i32, i32) {
    %c0_i32 = arith.constant 0 : i32
    %c0_i32_0 = arith.constant 0 : i32
    %c0_i32_1 = arith.constant 0 : i32
    return %c0_i32, %c0_i32_0 : i32, i32
  }
  func.func @transform_3(%arg0: i32) -> (i32, i32) {
    %c0_i32 = arith.constant 0 : i32
    %c0_i32_0 = arith.constant 0 : i32
    %c0_i32_1 = arith.constant 0 : i32
    return %c0_i32, %c0_i32_0 : i32, i32
  }
  func.func @transform_4(%arg0: i32) -> (i32, i32, i32) {
    %c0_i32 = arith.constant 0 : i32
    %c0_i32_0 = arith.constant 0 : i32
    %c0_i32_1 = arith.constant 0 : i32
    return %arg0, %c0_i32, %c0_i32_0 : i32, i32, i32
  }
}

</mosaic_0001>

<bundles_post_ra>
// kernel: features_memory_domain_forward.1
= control target key start
LH: loop header
LB: loop body
LE: loop exit
PB: predicated region body
PF: predicated region fallthrough
CT: control target
= control target key end

     0   :  { %9 = vsyncpa [#allocation3], 0  ;;  %s2488_s0 = inlined_call_operand.vmem [shape: f32[2,64,32], index: 0, kind: input, shape index: {}]   ;;  %s2489_s1 = inlined_call_operand.vmem [shape: f32[8,32], index: 1, kind: input, shape index: {}]   ;;  %s2490_s2 = inlined_call_operand.vmem [shape: f32[688,32], index: 2, kind: input, shape index: {}]   ;;  %s2491_s3 = inlined_call_operand.vmem [shape: f32[8,32], index: 3, kind: input, shape index: {}]   ;;  %s2492_s4 = inlined_call_operand.hbm [shape: f32[2,64,32], index: 4, kind: output, shape index: {}]  }
   0x1   :  { %11 = vsyncpa [#allocation3 + $0x1], 0  ;;  %s1764_s15 = smov 0   ;;  %s1766_s16 = smov 0  }
   0x2   :  { %s1768_s17 = smov 0   ;;  %s1770_s18 = smov 0  }
   0x3 LB: > { %s1785_s19 = sadd.s32 4294967295, %s1731_s18   ;;  %s1494_s20 = sadd.s32 4294967294, %s1731_s18   ;;  %s1731_s18 = sphi %s1770_s18, %s2502_s18   ;;  %s1727_s17 = sphi %s1768_s17, %s2501_s17   ;;  %s1723_s16 = sphi %s1766_s16, %s2500_s16   ;;  %s1719_s15 = sphi %s1764_s15, %s2499_s15  }
   0x4   : > { %s1789_s21 = sadd.s32 1, %s1731_s18   ;;  %s113_s22 = sadd.s32 1, %s1727_s17 }
   0x5   : > { %s110_s23 = ssub.s32 %s1731_s18, %s1789_s21  ;;  %p123_p0 = scmp.ne.s32.totalorder %s1727_s17, %s1723_s16 }
   0x6   : > { %p111_p1 = scmp.eq.s32.totalorder %s110_s23, 0  ;;  %p124_p2 = scmp.eq.s32.totalorder %s1785_s19, 1 }
   0x7   : > { %p129_p3 = scmp.ne.s32.totalorder %s1723_s16, %s1719_s15  ;;  %p130_p4 = scmp.eq.s32.totalorder %s1494_s20, 1 }
   0x8   : > { %s1800_s24 = scalar_select %p111_p1, %s1727_s17, %s113_s22  }
   0x9   : > { %p1802_p5 = por %p124_p2, %p123_p0  ;;  %p1806_p6 = por %p130_p4, %p129_p3 }
   0xa   : > { %p1497_p7 = scmp.ge.s32.totalorder %s1731_s18, 1  ;;  %p165_p8 = scmp.lt.s32.totalorder %s1731_s18, 3 }
   0xc   : > { %p166_p9 = pnand %p1497_p7, %p165_p8 }
   0xd   : > { %p191_p10 = scmp.lt.s32.totalorder (!%p166_p9), %s1785_s19, 1  ;;  %s1733_s6 = smov (!%p166_p9), 112  }
   0xe   : > { %169 = sbr.rel (%p166_p9) target bundleno = 1537 (0x601), region = 36  ;;  %s1735_s9 = smov (!%p166_p9), 64  }
  0x13   : > { %v207_v0 = vld [vmem:[%s2490_s2 + $0x18] sm:$0xff]  ;;  %v206_v1 = vld [vmem:[%s2490_s2 + $0x10] sm:$0xff]  ;;  %v205_v2 = vld [vmem:[%s2490_s2 + $0x8] sm:$0xff]  ;;  %s192_s7 = scalar_select %p191_p10, %s1785_s19, 1  ;;  %vm210_vm0 = vcmask 261120   ;;  %vm288_vm1 = vcmask 130048  }
  0x14   : > { %247 = vmatpush.msra.mxu0 %v207_v0  ;;  %1576 = vmatpush.msra.mxu2 %v207_v0  ;;  %v204_v3 = vld [vmem:[%s2490_s2] sm:$0xff]  ;;  %v366_v6 = vld [vmem:[%s2490_s2 + $0x48] sm:$0xff]  ;;  %v364_v8 = vld [vmem:[%s2490_s2 + $0x38] sm:$0xff]  ;;  %vm489_vm2 = vcmask 64512   ;;  %vm975_vm5 = vcmask 1046528   ;;  %vm1031_vm6 = vcmask 523264  }
  0x15   : > { %s1574_s10 = sshll.u32 %s192_s7, 6  ;;  %v365_v7 = vld [vmem:[%s2490_s2 + $0x40] sm:$0xff]  ;;  %v363_v9 = vld [vmem:[%s2490_s2 + $0x30] sm:$0xff]  ;;  %v285_v17 = vld [vmem:[%s2490_s2 + $0x28] sm:$0xff]  ;;  %vm940_vm9 = vcmask 1040384   ;;  %s1689_s7 = scalar_lea.hbm %s2492_s4, 128 }
  0x16   : > { %248 = vmatpush.msra.mxu0 %v206_v1  ;;  %1577 = vmatpush.msra.mxu2 %v206_v1  ;;  %s195_s13 = scalar_lea.vmem %s2488_s0, %s1574_s10  ;;  %v362_v16 = vld [vmem:[%s2489_s1] sm:$0xff]  ;;  %v394_v24 = vld [vmem:[%s2490_s2 + $0x58] sm:$0xff]  ;;  %v393_v27 = vld [vmem:[%s2490_s2 + $0x50] sm:$0xff]  ;;  %s188_s10 = sand.u32 1, %s1723_s16  }
  0x17   : > { %v1829_v4 = vld [vmem:[%s195_s13] sm:$0xff]  ;;  %v1849_v10 = vld [vmem:[%s195_s13 + $0x8] sm:$0xff]  ;;  %v1857_v12 = vld [vmem:[%s195_s13 + $0x10] sm:$0xff]  ;;  %327 = vmatpush.msra.mxu1 %v285_v17  ;;  %414 = vmatpush.msra.mxu3 %v394_v24  ;;  %s1498_s14 = sshll.u32 %s188_s10, 6 }
  0x18   : > { %249 = vmatpush.msra.mxu0 %v205_v2  ;;  %1578 = vmatpush.msra.mxu2 %v205_v2  ;;  %v1831_v5 = vld [vmem:[%s195_s13 + $0x20] sm:$0xff]  ;;  %v1851_v11 = vld [vmem:[%s195_s13 + $0x28] sm:$0xff]  ;;  %v1859_v13 = vld [vmem:[%s195_s13 + $0x30] sm:$0xff] }
  0x19   : > { %v1865_v14 = vld [vmem:[%s195_s13 + $0x18] sm:$0xff]  ;;  %v284_v18 = vld [vmem:[%s2490_s2 + $0x20] sm:$0xff]  ;;  %415 = vmatpush.msra.mxu3 %v393_v27 }
  0x1a   : > { %250 = vmatpush.msra.mxu0 %v204_v3  ;;  %1579 = vmatpush.msra.mxu2 %v204_v3  ;;  %v1867_v15 = vld [vmem:[%s195_s13 + $0x38] sm:$0xff]  ;;  %v1631_v19 = vld [vmem:[%s2491_s3] ss:$0 sm:$0xff]  ;;  %v1632_v40 = vld [vmem:[%s2491_s3 + $0x2] ss:$0 sm:$0xff]  ;;  %s1734_s13 = smov 32  }
  0x1b   : > { %1501 = vmatmul.msk.f32.vlgmr.msra.gmra.mxu0 %vm210_vm0, %v1829_v4  ;;  %1505 = vmatmul.msk.f32.vlgmr.msra.gmra.mxu2 %vm210_vm0, %v1831_v5  ;;  %v1634_v53 = vld [vmem:[%s2491_s3 + $0x3] ss:$0 sm:$0xff]  ;;  %v1633_v54 = vld [vmem:[%s2491_s3 + $0x1] ss:$0 sm:$0xff] }
  0x1c   : > { %384 = vmatpush.msrb.mxu2 %v366_v6  ;;  %328 = vmatpush.msra.mxu1 %v284_v18 }
  0x1e   : > { %385 = vmatpush.msrb.mxu2 %v365_v7 }
  0x20   : > { %386 = vmatpush.msrb.mxu2 %v364_v8 }
  0x22   : > { %387 = vmatpush.msrb.mxu2 %v363_v9 }
  0x23   : > { %1502 = vmatmul.msk.f32.gmra.mxu0 %vm210_vm0, %v1849_v10  ;;  %1506 = vmatmul.msk.f32.gmra.mxu2 %vm210_vm0, %v1851_v11 }
  0x2b   : > { %1503 = vmatmul.msk.f32.gmra.mxu0 %vm210_vm0, %v1857_v12  ;;  %1507 = vmatmul.msk.f32.gmra.mxu2 %vm210_vm0, %v1859_v13 }
  0x33   : > { %1504 = vmatmul.msk.f32.gmra.mxu0 %vm210_vm0, %v1865_v14  ;;  %1508 = vmatmul.msk.f32.gmra.mxu2 %vm210_vm0, %v1867_v15 }
  0x3b   : > { %1517 = vmatmul.msk.f32.vlgmr.msrb.gmra.mxu2 %vm210_vm0, %v362_v16 }
  0x98   : > { %v252_v20 = vpop.f32.mrf.mxu0 }
  0x99   : > { %v253_v21 = vadd.f32 %v1631_v19, %v252_v20 }
  0x9b   : > { %v276_v22 = vmax.f32 %v253_v21, 0.0 }
  0x9d   : > { %1509 = vmatmul.msk.f32.vlgmr.msra.gmra.mxu1 %vm288_vm1, %v276_v22 }
  0x9e   : > { %v264_v23 = vpop.f32.mrf.mxu2 }
  0x9f   : > { %v265_v38 = vadd.f32 %v1631_v19, %v264_v23 }
  0xa0   : > { %v255_v25 = vpop.f32.mrf.mxu0 }
  0xa1   : > { %v256_v26 = vadd.f32 %v1631_v19, %v255_v25  ;;  %v280_v39 = vmax.f32 %v265_v38, 0.0 }
  0xa3   : > { %v277_v28 = vmax.f32 %v256_v26, 0.0 }
  0xa5   : > { %1510 = vmatmul.msk.f32.gmra.mxu1 %vm288_vm1, %v277_v28 }
  0xa6   : > { %v267_v29 = vpop.f32.mrf.mxu2 }
  0xa7   : > { %v268_v42 = vadd.f32 %v1631_v19, %v267_v29 }
  0xa8   : > { %v258_v30 = vpop.f32.mrf.mxu0 }
  0xa9   : > { %v259_v31 = vadd.f32 %v1631_v19, %v258_v30  ;;  %v281_v45 = vmax.f32 %v268_v42, 0.0 }
  0xab   : > { %v278_v32 = vmax.f32 %v259_v31, 0.0 }
  0xad   : > { %1511 = vmatmul.msk.f32.gmra.mxu1 %vm288_vm1, %v278_v32 }
  0xae   : > { %v270_v33 = vpop.f32.mrf.mxu2 }
  0xaf   : > { %v271_v46 = vadd.f32 %v1631_v19, %v270_v33 }
  0xb0   : > { %v261_v34 = vpop.f32.mrf.mxu0 }
  0xb1   : > { %v262_v35 = vadd.f32 %v1631_v19, %v261_v34  ;;  %v282_v47 = vmax.f32 %v271_v46, 0.0 }
  0xb3   : > { %v279_v36 = vmax.f32 %v262_v35, 0.0 }
  0xb5   : > { %1512 = vmatmul.msk.f32.gmra.mxu1 %vm288_vm1, %v279_v36 }
  0xb6   : > { %v273_v37 = vpop.f32.mrf.mxu2 }
  0xb7   : > { %v274_v48 = vadd.f32 %v1631_v19, %v273_v37 }
  0xb9   : > { %v283_v49 = vmax.f32 %v274_v48, 0.0 }
  0xbd   : > { %1513 = vmatmul.msk.f32.gmra.mxu1 %vm288_vm1, %v280_v39 }
  0xbe   : > { %v389_v41 = vpop.f32.mrf.mxu2 }
  0xbf   : > { %v1900_v43 = vadd.f32 %v1632_v40, %v389_v41 }
  0xc1   : > { %v392_v44 = vmax.f32 %v1900_v43, 0.0 }
  0xc3   : > { %1518 = vmatmul.msk.f32.vlgmr.msra.gmra.mxu3 %vm288_vm1, %v392_v44 }
  0xc5   : > { %1514 = vmatmul.msk.f32.gmra.mxu1 %vm288_vm1, %v281_v45 }
  0xcd   : > { %1515 = vmatmul.msk.f32.gmra.mxu1 %vm288_vm1, %v282_v47 }
  0xd5   : > { %1516 = vmatmul.msk.f32.gmra.mxu1 %vm288_vm1, %v283_v49 }
 0x11a   : > { %v330_v50 = vpop.f32.mrf.mxu1 }
 0x11b   : > { %v331_v56 = vadd.f32 %v1633_v54, %v330_v50 }
 0x11d   : > { %v354_v61 = vmax.f32 %v331_v56, 0.0 }
 0x122   : > { %v333_v51 = vpop.f32.mrf.mxu1 }
 0x123   : > { %v334_v63 = vadd.f32 %v1633_v54, %v333_v51 }
 0x125   : > { %v355_v2 = vmax.f32 %v334_v63, 0.0 }
 0x12a   : > { %v336_v52 = vpop.f32.mrf.mxu1 }
 0x12b   : > { %v337_v57 = vadd.f32 %v1633_v54, %v336_v52 }
 0x12d   : > { %v356_v62 = vmax.f32 %v337_v57, 0.0 }
 0x132   : > { %v339_v55 = vpop.f32.mrf.mxu1 }
 0x133   : > { %v340_v0 = vadd.f32 %v1633_v54, %v339_v55 }
 0x135   : > { %v357_v3 = vmax.f32 %v340_v0, 0.0 }
 0x13a   : > { %v342_v1 = vpop.f32.mrf.mxu1 }
 0x13b   : > { %v343_v6 = vadd.f32 %v1633_v54, %v342_v1 }
 0x13d   : > { %v358_v8 = vmax.f32 %v343_v6, 0.0 }
 0x142   : > { %v345_v7 = vpop.f32.mrf.mxu1 }
 0x143   : > { %v346_v9 = vadd.f32 %v1633_v54, %v345_v7 }
 0x145   : > { %v359_v17 = vmax.f32 %v346_v9, 0.0 }
 0x146   : > { %v417_v58 = vpop.f32.mrf.mxu3 }
 0x147   : > { %v418_v59 = vadd.f32 %v1634_v53, %v417_v58 }
 0x149   : > { %v420_v60 = vmax.f32 %v418_v59, 0.0 }
 0x14a   : > { %v348_v16 = vpop.f32.mrf.mxu1 }
 0x14b   : > { %1519 = vmatpush.xpose.msk.msra.mxu2 %vm288_vm1, %v420_v60  ;;  %1580 = vmatpush.xpose.msk.msrb.mxu3 %vm288_vm1, %v420_v60  ;;  %v349_v18 = vadd.f32 %v1633_v54, %v348_v16 }
 0x14d   : > { %v360_v19 = vmax.f32 %v349_v18, 0.0 }
 0x14e   : > { %1520 = vmatmul.msk.f32.vlgmr.msra.gmra.mxu2 %vm288_vm1, %v354_v61  ;;  %1522 = vmatmul.msk.f32.vlgmr.msrb.gmra.mxu3 %vm288_vm1, %v356_v62 }
 0x152   : > { %v351_v20 = vpop.f32.mrf.mxu1 }
 0x153   : > { %v352_v21 = vadd.f32 %v1633_v54, %v351_v20 }
 0x155   : > { %v361_v22 = vmax.f32 %v352_v21, 0.0 }
 0x156   : > { %1521 = vmatmul.msk.f32.gmra.mxu2 %vm288_vm1, %v355_v2  ;;  %1523 = vmatmul.msk.f32.gmra.mxu3 %vm288_vm1, %v357_v3 }
 0x15e   : > { %1524 = vmatmul.msk.f32.gmra.mxu3 %vm288_vm1, %v358_v8 }
 0x166   : > { %1525 = vmatmul.msk.f32.gmra.mxu3 %vm288_vm1, %v359_v17 }
 0x16e   : > { %1526 = vmatmul.msk.f32.gmra.mxu3 %vm288_vm1, %v360_v19 }
 0x176   : > { %1527 = vmatmul.msk.f32.gmra.mxu3 %vm288_vm1, %v361_v22 }
 0x1d1   : > { %v465_v23 = vpop.f32.mrf.mxu2  ;;  %v471_v24 = vpop.f32.mrf.mxu3 }
 0x1d2   : > { %v496_v25 = vsel %vm489_vm2, %v471_v24, -inf  ;;  %v490_v26 = vsel %vm489_vm2, %v465_v23, -inf }
 0x1d3   : > { %497 = vmax.xlane.f32.xlu1 %v496_v25  ;;  %491 = vmax.xlane.f32.xlu0 %v490_v26 }
 0x1d9   : > { %v468_v27 = vpop.f32.mrf.mxu2  ;;  %v474_v28 = vpop.f32.mrf.mxu3 }
 0x1da   : > { %v499_v29 = vsel %vm489_vm2, %v474_v28, -inf  ;;  %v493_v30 = vsel %vm489_vm2, %v468_v27, -inf }
 0x1db   : > { %500 = vmax.xlane.f32.xlu1 %v499_v29  ;;  %494 = vmax.xlane.f32.xlu0 %v493_v30 }
 0x1e1   : > { %v477_v31 = vpop.f32.mrf.mxu3 }
 0x1e2   : > { %v502_v32 = vsel %vm489_vm2, %v477_v31, -inf }
 0x1e3   : > { %503 = vmax.xlane.f32.xlu2 %v502_v32 }
 0x1e9   : > { %v480_v33 = vpop.f32.mrf.mxu3 }
 0x1ea   : > { %v505_v34 = vsel %vm489_vm2, %v480_v33, -inf }
 0x1eb   : > { %506 = vmax.xlane.f32.xlu2 %v505_v34 }
 0x1f1   : > { %v483_v35 = vpop.f32.mrf.mxu3 }
 0x1f2   : > { %v508_v36 = vsel %vm489_vm2, %v483_v35, -inf }
 0x1f3   : > { %509 = vmax.xlane.f32.xlu0 %v508_v36 }
 0x1f9   : > { %v486_v37 = vpop.f32.mrf.mxu3 }
 0x1fa   : > { %v511_v38 = vsel %vm489_vm2, %v486_v37, -inf }
 0x1fb   : > { %512 = vmax.xlane.f32.xlu2 %v511_v38  ;;  %v646_v38 = vld [vmem:[%s2490_s2 + $0x60] sm:$0xff] }
 0x246   : > { %v498_v39 = vpop.xlane.xlu1 %497  ;;  %v492_v40 = vpop.xlane.xlu0 %491 }
 0x247   : > { %v516_v41 = vsub.f32 %v471_v24, %v498_v39  ;;  %v514_v42 = vsub.f32 %v465_v23, %v492_v40 }
 0x249   : > { %v526_v45 = vmul.f32 1.442695, %v516_v41  ;;  %v522_v46 = vmul.f32 1.442695, %v514_v42 }
 0x24b   : > { %1637 = vpow2.f32 %v526_v45 }
 0x24c   : > { %1639 = vpow2.f32 %v522_v46 }
 0x24e   : > { %v495_v47 = vpop.xlane.xlu0 %494  ;;  %v501_v48 = vpop.xlane.xlu1 %500 }
 0x24f   : > { %v515_v49 = vsub.f32 %v468_v27, %v495_v47  ;;  %v517_v53 = vsub.f32 %v474_v28, %v501_v48 }
 0x251   : > { %v1933_v50 = vpop.eup %1637  ;;  %v524_v51 = vmul.f32 1.442695, %v515_v49  ;;  %v528_v56 = vmul.f32 1.442695, %v517_v53 }
 0x252   : > { %v1640_v52 = vpop.eup %1639  ;;  %v544_v54 = vsel %vm489_vm2, %v1933_v50, 0.0 }
 0x253   : > { %545 = vadd.xlane.f32.xlu2 %v544_v54  ;;  %v538_v55 = vsel %vm489_vm2, %v1640_v52, 0.0  ;;  %1641 = vpow2.f32 %v524_v51 }
 0x254   : > { %539 = vadd.xlane.f32.xlu1 %v538_v55  ;;  %1643 = vpow2.f32 %v528_v56 }
 0x256   : > { %v504_v57 = vpop.xlane.xlu2 %503 }
 0x257   : > { %v518_v58 = vsub.f32 %v477_v31, %v504_v57 }
 0x259   : > { %v530_v59 = vmul.f32 1.442695, %v518_v58  ;;  %v1642_v60 = vpop.eup %1641 }
 0x25a   : > { %v541_v61 = vsel %vm489_vm2, %v1642_v60, 0.0  ;;  %v1644_v0 = vpop.eup %1643 }
 0x25b   : > { %1645 = vpow2.f32 %v530_v59  ;;  %542 = vadd.xlane.f32.xlu0 %v541_v61  ;;  %v547_v6 = vsel %vm489_vm2, %v1644_v0, 0.0 }
 0x25e   : > { %v507_v62 = vpop.xlane.xlu2 %506 }
 0x25f   : > { %v519_v63 = vsub.f32 %v480_v33, %v507_v62 }
 0x261   : > { %v1646_v1 = vpop.eup %1645  ;;  %v532_v2 = vmul.f32 1.442695, %v519_v63 }
 0x262   : > { %v550_v3 = vsel %vm489_vm2, %v1646_v1, 0.0 }
 0x263   : > { %1647 = vpow2.f32 %v532_v2  ;;  %551 = vadd.xlane.f32.xlu2 %v550_v3  ;;  %548 = vadd.xlane.f32.xlu0 %v547_v6 }
 0x266   : > { %v510_v7 = vpop.xlane.xlu0 %509 }
 0x267   : > { %v520_v8 = vsub.f32 %v483_v35, %v510_v7 }
 0x269   : > { %v1648_v9 = vpop.eup %1647  ;;  %v534_v16 = vmul.f32 1.442695, %v520_v8 }
 0x26a   : > { %v553_v17 = vsel %vm489_vm2, %v1648_v9, 0.0 }
 0x26b   : > { %1649 = vpow2.f32 %v534_v16  ;;  %554 = vadd.xlane.f32.xlu0 %v553_v17  ;;  %v1065_v17 = vld [vmem:[%s2490_s2 + $0x128] sm:$0xff] }
 0x26d   : > { %578 = vrot.lane.b32.xlu1 %v392_v44, %s1733_s6 }
 0x26e   : > { %v513_v18 = vpop.xlane.xlu2 %512 }
 0x26f   : > { %v521_v19 = vsub.f32 %v486_v37, %v513_v18  ;;  %v647_v37 = vld [vmem:[%s2490_s2 + $0x68] sm:$0xff]  ;;  %v1064_v18 = vld [vmem:[%s2490_s2 + $0x120] sm:$0xff] }
 0x270   : > { %688 = vmatpush.msrb.mxu1 %v647_v37  ;;  %v763_v37 = vlaneseq }
 0x271   : > { %v1650_v20 = vpop.eup %1649  ;;  %v536_v21 = vmul.f32 1.442695, %v521_v19  ;;  %v1063_v19 = vld [vmem:[%s2490_s2 + $0x118] sm:$0xff] }
 0x272   : > { %v556_v22 = vsel %vm489_vm2, %v1650_v20, 0.0  ;;  %689 = vmatpush.msrb.mxu1 %v646_v38  ;;  %v2027_v38 = vshrl.u32 %v763_v37, 7 }
 0x273   : > { %1651 = vpow2.f32 %v536_v21  ;;  %557 = vadd.xlane.f32.xlu2 %v556_v22 }
 0x274   : > { %1241 = vmatpush.msra.mxu1 %v1065_v17 }
 0x276   : > { %1242 = vmatpush.msra.mxu1 %v1064_v18 }
 0x278   : > { %1243 = vmatpush.msra.mxu1 %v1063_v19 }
 0x279   : > { %v1652_v23 = vpop.eup %1651 }
 0x27a   : > { %v559_v24 = vsel %vm489_vm2, %v1652_v23, 0.0 }
 0x27b   : > { %560 = vadd.xlane.f32.xlu0 %v559_v24 }
 0x2c6   : > { %v546_v44 = vpop.xlane.xlu2 %545 }
 0x2c7   : > { %v540_v25 = vpop.xlane.xlu1 %539 }
 0x2c8   : > { %1653 = vrcp.f32 %v540_v25 }
 0x2ce   : > { %v543_v26 = vpop.xlane.xlu0 %542  ;;  %v1654_v27 = vpop.eup %1653 }
 0x2cf   : > { %1655 = vrcp.f32 %v543_v26  ;;  %v570_v28 = vmul.f32 %v1654_v27, %v1640_v52 }
 0x2d0   : > { %1657 = vrcp.f32 %v546_v44 }
 0x2d5   : > { %v1656_v29 = vpop.eup %1655 }
 0x2d6   : > { %v571_v30 = vmul.f32 %v1656_v29, %v1642_v60  ;;  %v549_v31 = vpop.xlane.xlu0 %548  ;;  %v1658_v32 = vpop.eup %1657  ;;  %v1972_v60 = vld [vmem:[%s2491_s3 + $0x4] ss:$0 sm:$0xff] }
 0x2d7   : > { %1659 = vrcp.f32 %v549_v31  ;;  %v572_v33 = vmul.f32 %v1658_v32, %v1933_v50  ;;  %v552_v34 = vpop.xlane.xlu2 %551  ;;  %v1060_v29 = vld [vmem:[%s2490_s2 + $0x100] sm:$0xff]  ;;  %v1058_v31 = vld [vmem:[%s2490_s2 + $0xf0] sm:$0xff]  ;;  %v1089_v32 = vld [vmem:[%s2490_s2 + $0x1e8] sm:$0xff] }
 0x2d8   : > { %1661 = vrcp.f32 %v552_v34  ;;  %1156 = vmatpush.msra.mxu3 %v1089_v32  ;;  %v1087_v34 = vld [vmem:[%s2490_s2 + $0x1d8] sm:$0xff] }
 0x2dd   : > { %v1660_v35 = vpop.eup %1659 }
 0x2de   : > { %v573_v36 = vmul.f32 %v1660_v35, %v1644_v0  ;;  %v555_v39 = vpop.xlane.xlu0 %554  ;;  %v1662_v40 = vpop.eup %1661  ;;  %v1086_v35 = vld [vmem:[%s2490_s2 + $0x1d0] sm:$0xff] }
 0x2df   : > { %v579_v43 = vpop.permute.xlu1 %578  ;;  %1663 = vrcp.f32 %v555_v39  ;;  %v574_v41 = vmul.f32 %v1662_v40, %v1646_v1  ;;  %v776_v39 = vand.u32 7, %v2027_v38 }
 0x2e0   : > { %620 = vmatpush.msrb.mxu2 %v579_v43 }
 0x2e1   : > { %1528 = vmatmul.msk.f32.vlgmr.msrb.gmra.mxu2 %vm489_vm2, %v570_v28  ;;  %vm2030_vm3 = vcmp.ne.s32.totalorder %v776_v39, 7  ;;  %vm900_vm4 = vcmp.ne.s32.totalorder %v776_v39, 0  ;;  %v1075_v39 = vld [vmem:[%s2490_s2 + $0x178] sm:$0xff] }
 0x2e5   : > { %v1664_v45 = vpop.eup %1663 }
 0x2e6   : > { %v558_v42 = vpop.xlane.xlu2 %557  ;;  %v575_v46 = vmul.f32 %v1664_v45, %v1648_v9 }
 0x2e7   : > { %1665 = vrcp.f32 %v558_v42  ;;  %v1084_v42 = vld [vmem:[%s2490_s2 + $0x1c0] sm:$0xff] }
 0x2e9   : > { %1529 = vmatmul.msk.f32.gmra.mxu2 %vm489_vm2, %v571_v30  ;;  %v1059_v30 = vld [vmem:[%s2490_s2 + $0xf8] sm:$0xff] }
 0x2ed   : > { %v1666_v48 = vpop.eup %1665 }
 0x2ee   : > { %v561_v47 = vpop.xlane.xlu0 %560  ;;  %v576_v49 = vmul.f32 %v1666_v48, %v1650_v20  ;;  %v1062_v20 = vld [vmem:[%s2490_s2 + $0x110] sm:$0xff] }
 0x2ef   : > { %1667 = vrcp.f32 %v561_v47  ;;  %1244 = vmatpush.msra.mxu1 %v1062_v20 }
 0x2f1   : > { %1530 = vmatmul.msk.f32.gmra.mxu2 %vm489_vm2, %v572_v33  ;;  %v1088_v33 = vld [vmem:[%s2490_s2 + $0x1e0] sm:$0xff] }
 0x2f2   : > { %1157 = vmatpush.msra.mxu3 %v1088_v33 }
 0x2f4   : > { %1158 = vmatpush.msra.mxu3 %v1087_v34 }
 0x2f5   : > { %v1668_v50 = vpop.eup %1667 }
 0x2f6   : > { %v577_v51 = vmul.f32 %v1668_v50, %v1652_v23  ;;  %v1061_v23 = vld [vmem:[%s2490_s2 + $0x108] sm:$0xff]  ;;  %1159 = vmatpush.msra.mxu3 %v1086_v35 }
 0x2f7   : > { %1245 = vmatpush.msra.mxu1 %v1061_v23 }
 0x2f9   : > { %1531 = vmatmul.msk.f32.gmra.mxu2 %vm489_vm2, %v573_v36  ;;  %1246 = vmatpush.msra.mxu1 %v1060_v29  ;;  %v1085_v36 = vld [vmem:[%s2490_s2 + $0x1c8] sm:$0xff] }
 0x2fa   : > { %1160 = vmatpush.msra.mxu3 %v1085_v36  ;;  %v1076_v36 = vld [vmem:[%s2490_s2 + $0x180] sm:$0xff] }
 0x2fb   : > { %1247 = vmatpush.msra.mxu1 %v1059_v30  ;;  %v1078_v30 = vld [vmem:[%s2490_s2 + $0x190] sm:$0xff] }
 0x2fc   : > { %1161 = vmatpush.msra.mxu3 %v1084_v42 }
 0x2fd   : > { %1248 = vmatpush.msra.mxu1 %v1058_v31 }
 0x301   : > { %1532 = vmatmul.msk.f32.gmra.mxu2 %vm489_vm2, %v574_v41 }
 0x309   : > { %1533 = vmatmul.msk.f32.gmra.mxu2 %vm489_vm2, %v575_v46 }
 0x311   : > { %1534 = vmatmul.msk.f32.gmra.mxu2 %vm489_vm2, %v576_v49  ;;  %v1083_v49 = vld [vmem:[%s2490_s2 + $0x1b8] sm:$0xff] }
 0x312   : > { %1162 = vmatpush.msra.mxu3 %v1083_v49  ;;  %v1073_v49 = vld [vmem:[%s2490_s2 + $0x168] sm:$0xff] }
 0x319   : > { %1535 = vmatmul.msk.f32.gmra.mxu2 %vm489_vm2, %v577_v51 }
 0x364   : > { %v622_v52 = vpop.f32.mrf.mxu2 }
 0x365   : > { %1536 = vmatmul.msk.f32.vlgmr.msrb.gmra.mxu1 %vm288_vm1, %v622_v52 }
 0x36c   : > { %v625_v53 = vpop.f32.mrf.mxu2 }
 0x36d   : > { %1537 = vmatmul.msk.f32.gmra.mxu1 %vm288_vm1, %v625_v53 }
 0x374   : > { %v628_v54 = vpop.f32.mrf.mxu2 }
 0x375   : > { %1538 = vmatmul.msk.f32.gmra.mxu1 %vm288_vm1, %v628_v54  ;;  %v765_v54 = vadd.s32 8, %v2027_v38 }
 0x37c   : > { %v631_v55 = vpop.f32.mrf.mxu2 }
 0x37d   : > { %1539 = vmatmul.msk.f32.gmra.mxu1 %vm288_vm1, %v631_v55  ;;  %v783_v55 = vand.u32 7, %v765_v54  ;;  %v1071_v54 = vld [vmem:[%s2490_s2 + $0x158] sm:$0xff] }
 0x37f   : > { %vm869_vm7 = vcmp.ne.s32.totalorder %v783_v55, 7  ;;  %vm901_vm8 = vcmp.ne.s32.totalorder %v783_v55, 0  ;;  %v1070_v55 = vld [vmem:[%s2490_s2 + $0x150] sm:$0xff] }
 0x384   : > { %v634_v56 = vpop.f32.mrf.mxu2 }
 0x385   : > { %1540 = vmatmul.msk.f32.gmra.mxu1 %vm288_vm1, %v634_v56  ;;  %v766_v56 = vadd.s32 16, %v2027_v38 }
 0x38c   : > { %v637_v57 = vpop.f32.mrf.mxu2 }
 0x38d   : > { %1541 = vmatmul.msk.f32.gmra.mxu1 %vm288_vm1, %v637_v57  ;;  %v2055_v57 = vadd.s32 40, %v2027_v38 }
 0x394   : > { %v640_v58 = vpop.f32.mrf.mxu2 }
 0x395   : > { %1542 = vmatmul.msk.f32.gmra.mxu1 %vm288_vm1, %v640_v58 }
 0x39c   : > { %v643_v59 = vpop.f32.mrf.mxu2 }
 0x39d   : > { %1543 = vmatmul.msk.f32.gmra.mxu1 %vm288_vm1, %v643_v59 }
 0x3e2   : > { %v691_v61 = vpop.f32.mrf.mxu1 }
 0x3e3   : > { %v692_v62 = vadd.f32 %v1972_v60, %v691_v61 }
 0x3e5   : > { %v715_v63 = vmax.f32 %v692_v62, 0.0 }
 0x3e7   : > { %731 = vrot.lane.b32.xlu2 %v715_v63, %s1734_s13 }
 0x3ea   : > { %v694_v0 = vpop.f32.mrf.mxu1 }
 0x3eb   : > { %v695_v1 = vadd.f32 %v1972_v60, %v694_v0 }
 0x3ed   : > { %v716_v2 = vmax.f32 %v695_v1, 0.0  ;;  %v790_v1 = vand.u32 7, %v766_v56 }
 0x3ef   : > { %733 = vrot.lane.b32.xlu1 %v716_v2, %s1734_s13  ;;  %v811_v2 = vand.u32 7, %v2055_v57  ;;  %vm870_vm10 = vcmp.ne.s32.totalorder %v790_v1, 7  ;;  %vm902_vm11 = vcmp.ne.s32.totalorder %v790_v1, 0 }
 0x3f1   : > { %vm2073_vm12 = vcmp.ne.s32.totalorder %v811_v2, 7  ;;  %vm905_vm2 = vcmp.ne.s32.totalorder %v811_v2, 0 }
 0x3f2   : > { %v697_v3 = vpop.f32.mrf.mxu1 }
 0x3f3   : > { %v698_v6 = vadd.f32 %v1972_v60, %v697_v3 }
 0x3f5   : > { %v717_v7 = vmax.f32 %v698_v6, 0.0 }
 0x3f7   : > { %735 = vrot.lane.b32.xlu0 %v717_v7, %s1734_s13 }
 0x3fa   : > { %v700_v8 = vpop.f32.mrf.mxu1 }
 0x3fb   : > { %v701_v9 = vadd.f32 %v1972_v60, %v700_v8 }
 0x3fd   : > { %v718_v16 = vmax.f32 %v701_v9, 0.0 }
 0x3ff   : > { %737 = vrot.lane.b32.xlu1 %v718_v16, %s1734_s13 }
 0x402   : > { %v703_v21 = vpop.f32.mrf.mxu1 }
 0x403   : > { %v704_v22 = vadd.f32 %v1972_v60, %v703_v21 }
 0x405   : > { %v719_v24 = vmax.f32 %v704_v22, 0.0 }
 0x407   : > { %739 = vrot.lane.b32.xlu1 %v719_v24, %s1734_s13 }
 0x40a   : > { %v706_v25 = vpop.f32.mrf.mxu1 }
 0x40b   : > { %v707_v26 = vadd.f32 %v1972_v60, %v706_v25  ;;  %v1080_v25 = vld [vmem:[%s2490_s2 + $0x1a0] sm:$0xff] }
 0x40d   : > { %v720_v27 = vmax.f32 %v707_v26, 0.0  ;;  %v768_v26 = vadd.s32 32, %v2027_v38 }
 0x40f   : > { %741 = vrot.lane.b32.xlu2 %v720_v27, %s1734_s13  ;;  %v804_v33 = vand.u32 7, %v768_v26 }
 0x411   : > { %vm872_vm15 = vcmp.ne.s32.totalorder %v804_v33, 7  ;;  %vm904_vm1 = vcmp.ne.s32.totalorder %v804_v33, 0 }
 0x412   : > { %v709_v28 = vpop.f32.mrf.mxu1 }
 0x413   : > { %v710_v43 = vadd.f32 %v1972_v60, %v709_v28  ;;  %v1079_v28 = vld [vmem:[%s2490_s2 + $0x198] sm:$0xff] }
 0x415   : > { %v721_v44 = vmax.f32 %v710_v43, 0.0 }
 0x417   : > { %743 = vrot.lane.b32.xlu0 %v721_v44, %s1734_s13 }
 0x41a   : > { %v712_v45 = vpop.f32.mrf.mxu1 }
 0x41b   : > { %v713_v51 = vadd.f32 %v1972_v60, %v712_v45  ;;  %v1074_v45 = vld [vmem:[%s2490_s2 + $0x170] sm:$0xff] }
 0x41d   : > { %v722_v53 = vmax.f32 %v713_v51, 0.0  ;;  %v1072_v51 = vld [vmem:[%s2490_s2 + $0x160] sm:$0xff] }
 0x441   : > { %v732_v41 = vpop.permute.xlu2 %731 }
 0x442   : > { %v755_v46 = vsel %vm210_vm0, %v1829_v4, %v732_v41  ;;  %v1082_v4 = vld [vmem:[%s2490_s2 + $0x1b0] sm:$0xff] }
 0x443   : > { %v892_v47 = vsel %vm2030_vm3, %v755_v46, 0.0  ;;  %v924_v48 = vsel %vm900_vm4, %v755_v46, 0.0  ;;  %1006 = vrot.lane.b32.xlu1 %v755_v46, %s1735_s9  ;;  %1163 = vmatpush.msra.mxu3 %v1082_v4 }
 0x444   : > { %v976_v50 = vrot.slane %v924_v48, 1  ;;  %v2059_v60 = vrot.slane %v892_v47, 7 }
 0x446   : > { %v993_v52 = vsel %vm975_vm5, 0.0, %v976_v50 }
 0x447   : > { %1554 = vmatmul.msk.f32.vlgmr.msra.gmra.mxu1 %vm1031_vm6, %v993_v52  ;;  %v770_v52 = vadd.s32 48, %v2027_v38 }
 0x449   : > { %v818_v57 = vand.u32 7, %v770_v52  ;;  %v1285_v52 = vld [vmem:[%s2490_s2 + $0x248] sm:$0xff] }
 0x44b   : > { %745 = vrot.lane.b32.xlu1 %v722_v53, %s1734_s13  ;;  %vm874_vm3 = vcmp.ne.s32.totalorder %v818_v57, 7  ;;  %vm906_vm4 = vcmp.ne.s32.totalorder %v818_v57, 0  ;;  %v1048_v57 = vld [vmem:[%s2490_s2 + $0xa0] sm:$0xff]  ;;  %s1575_s13 = sshll.u32 %s1785_s19, 6  ;;  %s1417_s19 = scalar_lea.sflag [#allocation3], %s188_s10 }
 0x44c   : > { %s1428_s23 = scalar_lea.hbm %s2492_s4, %s1575_s13 }
 0x44d   : > { %s1431_s28 = sshll.u32 %s1428_s23, 4  ;;  %s1432_s28 = int_to_ptr.hbm [resolvable:$true] %s1431_s28 }
 0x44e   : > { %s1683_s29 = sshra.s32 %s1432_s28, 4  ;;  %s1684_s29 = int_to_ptr.hbm [resolvable:$true] %s1683_s29 }
 0x44f   : > { %s1685_s30 = scalar_lea.hbm %s1684_s29, 64  ;;  %p1690_p0 = scmp.lt.s32.totalorder %s1684_s29, %s2492_s4 }
 0x450   : > { %p1686_p11 = scmp.ne.s32.totalorder %s1684_s29, %s1685_s30  ;;  %p1691_p1 = scmp.lt.s32.totalorder %s1689_s7, %s1685_s30 }
 0x452   : > { %p1687_p12 = pnand %p1686_p11, %p1802_p5  ;;  %p1692_p2 = por %p1691_p1, %p1690_p0 }
 0x454   : > { %p1688_p13 = pneg %p1687_p12 }
 0x456   : > { %p1693_p3 = pnand %p1692_p2, %p1688_p13 }
 0x461   : > { %v734_v58 = vpop.permute.xlu1 %733 }
 0x462   : > { %v756_v59 = vsel %vm210_vm0, %v1849_v10, %v734_v58  ;;  %v767_v10 = vadd.s32 24, %v2027_v38  ;;  %v1069_v58 = vld [vmem:[%s2490_s2 + $0x148] sm:$0xff] }
 0x463   : > { %v893_v61 = vsel %vm869_vm7, %v756_v59, 0.0  ;;  %v925_v62 = vsel %vm901_vm8, %v756_v59, 0.0  ;;  %1008 = vrot.lane.b32.xlu2 %v756_v59, %s1735_s9 }
 0x464   : > { %v942_v63 = vrot.slane %v893_v61, 7  ;;  %v977_v0 = vrot.slane %v925_v62, 1  ;;  %v797_v23 = vand.u32 7, %v767_v10  ;;  %v1068_v61 = vld [vmem:[%s2490_s2 + $0x140] sm:$0xff] }
 0x466   : > { %v978_v3 = vsel %vm975_vm5, %v976_v50, %v977_v0  ;;  %v2066_v6 = vsel %vm940_vm9, %v2059_v60, %v942_v63  ;;  %vm871_vm13 = vcmp.ne.s32.totalorder %v797_v23, 7  ;;  %vm903_vm14 = vcmp.ne.s32.totalorder %v797_v23, 0 }
 0x467   : > { %1544 = vmatmul.msk.f32.vlgmr.msra.gmra.mxu3 %vm1031_vm6, %v978_v3  ;;  %1555 = vmatmul.msk.f32.gmra.mxu1 %vm1031_vm6, %v978_v3  ;;  %v771_v23 = vadd.s32 56, %v2027_v38 }
 0x469   : > { %v742_v8 = vpop.permute.xlu2 %741  ;;  %v736_v9 = vpop.permute.xlu0 %735 }
 0x46a   : > { %v757_v16 = vsel %vm210_vm0, %v1857_v12, %v736_v9  ;;  %v2081_v17 = vsel %vm210_vm0, %v1851_v11, %v742_v8  ;;  %v1081_v11 = vld [vmem:[%s2490_s2 + $0x1a8] sm:$0xff] }
 0x46b   : > { %1010 = vrot.lane.b32.xlu0 %v757_v16, %s1735_s9  ;;  %v894_v18 = vsel %vm870_vm10, %v757_v16, 0.0  ;;  %v926_v19 = vsel %vm902_vm11, %v757_v16, 0.0  ;;  %v897_v20 = vsel %vm2073_vm12, %v2081_v17, 0.0  ;;  %1107 = vmatpush.msrb.mxu0 %v1081_v11  ;;  %v929_v53 = vsel %vm905_vm2, %v2081_v17, 0.0  ;;  %v1297_v9 = vld [vmem:[%s2490_s2 + $0x2a8] sm:$0xff]  ;;  %v1296_v16 = vld [vmem:[%s2490_s2 + $0x2a0] sm:$0xff] }
 0x46c   : > { %v944_v21 = vrot.slane %v894_v18, 7  ;;  %v979_v22 = vrot.slane %v926_v19, 1  ;;  %v950_v46 = vrot.slane %v897_v20, 7  ;;  %v985_v56 = vrot.slane %v929_v53, 1  ;;  %1349 = vmatpush.msrb.mxu3 %v1297_v9  ;;  %v1294_v18 = vld [vmem:[%s2490_s2 + $0x290] sm:$0xff]  ;;  %v1293_v19 = vld [vmem:[%s2490_s2 + $0x288] sm:$0xff] }
 0x46d   : > { %1108 = vmatpush.msrb.mxu0 %v1080_v25  ;;  %v1292_v20 = vld [vmem:[%s2490_s2 + $0x280] sm:$0xff]  ;;  %v965_v25 = vsel %vm940_vm9, 0.0, %v2059_v60  ;;  %v1050_v53 = vld [vmem:[%s2490_s2 + $0xb0] sm:$0xff]  ;;  %v1277_v9 = vld [vmem:[%s2490_s2 + $0x208] sm:$0xff] }
 0x46e   : > { %v2088_v24 = vsel %vm975_vm5, %v977_v0, %v979_v22  ;;  %v2091_v12 = vsel %vm940_vm9, %v942_v63, %v944_v21  ;;  %v1067_v63 = vld [vmem:[%s2490_s2 + $0x138] sm:$0xff]  ;;  %1350 = vmatpush.msrb.mxu3 %v1296_v16  ;;  %v1276_v16 = vld [vmem:[%s2490_s2 + $0x200] sm:$0xff] }
 0x46f   : > { %1545 = vmatmul.msk.f32.gmra.mxu3 %vm1031_vm6, %v2088_v24  ;;  %1556 = vmatmul.msk.f32.gmra.mxu1 %vm1031_vm6, %v2088_v24 }
 0x470   : > { %1109 = vmatpush.msrb.mxu0 %v1079_v28 }
 0x471   : > { %v738_v27 = vpop.permute.xlu1 %737 }
 0x472   : > { %v758_v43 = vsel %vm210_vm0, %v1865_v14, %v738_v27  ;;  %v1077_v14 = vld [vmem:[%s2490_s2 + $0x188] sm:$0xff]  ;;  %1110 = vmatpush.msrb.mxu0 %v1078_v30  ;;  %v825_v27 = vand.u32 7, %v771_v23 }
 0x473   : > { %v895_v44 = vsel %vm871_vm13, %v758_v43, 0.0  ;;  %v927_v29 = vsel %vm903_vm14, %v758_v43, 0.0  ;;  %1012 = vrot.lane.b32.xlu2 %v758_v43, %s1735_s9  ;;  %1016 = vrot.lane.b32.xlu0 %v2081_v17, %s1735_s9  ;;  %v1295_v17 = vld [vmem:[%s2490_s2 + $0x298] sm:$0xff] }
 0x474   : > { %v946_v31 = vrot.slane %v895_v44, 7  ;;  %v981_v32 = vrot.slane %v927_v29, 1  ;;  %1111 = vmatpush.msrb.mxu0 %v1077_v14  ;;  %1351 = vmatpush.msrb.mxu3 %v1295_v17  ;;  %vm875_vm7 = vcmp.ne.s32.totalorder %v825_v27, 7  ;;  %vm907_vm8 = vcmp.ne.s32.totalorder %v825_v27, 0  ;;  %v1275_v17 = vld [vmem:[%s2490_s2 + $0x1f8] sm:$0xff] }
 0x476   : > { %v2119_v34 = vsel %vm975_vm5, %v979_v22, %v981_v32  ;;  %v2122_v35 = vsel %vm940_vm9, %v944_v21, %v946_v31  ;;  %1112 = vmatpush.msrb.mxu0 %v1076_v36  ;;  %1352 = vmatpush.msrb.mxu3 %v1294_v18  ;;  %v1291_v21 = vld [vmem:[%s2490_s2 + $0x278] sm:$0xff]  ;;  %v1290_v22 = vld [vmem:[%s2490_s2 + $0x270] sm:$0xff] }
 0x477   : > { %1546 = vmatmul.msk.f32.gmra.mxu3 %vm1031_vm6, %v2119_v34  ;;  %1557 = vmatmul.msk.f32.gmra.mxu1 %vm1031_vm6, %v2119_v34  ;;  %v1274_v18 = vld [vmem:[%s2490_s2 + $0x1f0] sm:$0xff] }
 0x478   : > { %1113 = vmatpush.msrb.mxu0 %v1075_v39  ;;  %1353 = vmatpush.msrb.mxu3 %v1293_v19  ;;  %v1057_v39 = vld [vmem:[%s2490_s2 + $0xe8] sm:$0xff] }
 0x479   : > { %v740_v37 = vpop.permute.xlu1 %739  ;;  %1192 = vmatpush.msra.mxu2 %v1057_v39 }
 0x47a   : > { %v759_v40 = vsel %vm210_vm0, %v1831_v5, %v740_v37  ;;  %1114 = vmatpush.msrb.mxu0 %v1074_v45  ;;  %1354 = vmatpush.msrb.mxu3 %v1292_v20  ;;  %v1288_v45 = vld [vmem:[%s2490_s2 + $0x260] sm:$0xff] }
 0x47b   : > { %v896_v41 = vsel %vm872_vm15, %v759_v40, 0.0  ;;  %v928_v42 = vsel %vm904_vm1, %v759_v40, 0.0  ;;  %1014 = vrot.lane.b32.xlu1 %v759_v40, %s1735_s9  ;;  %v1289_v40 = vld [vmem:[%s2490_s2 + $0x268] sm:$0xff] }
 0x47c   : > { %v948_v47 = vrot.slane %v896_v41, 7  ;;  %v983_v48 = vrot.slane %v928_v42, 1  ;;  %1115 = vmatpush.msrb.mxu0 %v1073_v49  ;;  %1355 = vmatpush.msrb.mxu3 %v1291_v21  ;;  %v1054_v42 = vld [vmem:[%s2490_s2 + $0xd0] sm:$0xff]  ;;  %v1052_v49 = vld [vmem:[%s2490_s2 + $0xc0] sm:$0xff] }
 0x47e   : > { %v2146_v5 = vsel %vm975_vm5, %v981_v32, %v983_v48  ;;  %v2149_v50 = vsel %vm940_vm9, %v946_v31, %v948_v47  ;;  %v2152_v4 = vsel %vm940_vm9, %v948_v47, %v950_v46  ;;  %1116 = vmatpush.msrb.mxu0 %v1072_v51  ;;  %v2173_v59 = vsel %vm975_vm5, %v983_v48, %v985_v56  ;;  %v1287_v48 = vld [vmem:[%s2490_s2 + $0x258] sm:$0xff] }
 0x47f   : > { %1547 = vmatmul.msk.f32.gmra.mxu3 %vm1031_vm6, %v2146_v5  ;;  %1558 = vmatmul.msk.f32.gmra.mxu1 %vm1031_vm6, %v2146_v5  ;;  %v1051_v51 = vld [vmem:[%s2490_s2 + $0xb8] sm:$0xff] }
 0x480   : > { %1117 = vmatpush.msrb.mxu0 %v1071_v54  ;;  %1356 = vmatpush.msrb.mxu3 %v1290_v22  ;;  %v1049_v54 = vld [vmem:[%s2490_s2 + $0xa8] sm:$0xff] }
 0x482   : > { %1118 = vmatpush.msrb.mxu0 %v1070_v55 }
 0x484   : > { %1119 = vmatpush.msrb.mxu0 %v1069_v58  ;;  %v1282_v58 = vld [vmem:[%s2490_s2 + $0x230] sm:$0xff] }
 0x486   : > { %1120 = vmatpush.msrb.mxu0 %v1068_v61  ;;  %v1047_v61 = vld [vmem:[%s2490_s2 + $0x98] sm:$0xff] }
 0x487   : > { %1548 = vmatmul.msk.f32.gmra.mxu3 %vm1031_vm6, %v2173_v59  ;;  %1559 = vmatmul.msk.f32.gmra.mxu1 %vm1031_vm6, %v2173_v59 }
 0x488   : > { %1121 = vmatpush.msrb.mxu0 %v1067_v63  ;;  %v1046_v63 = vld [vmem:[%s2490_s2 + $0x90] sm:$0xff] }
 0x489   : > { %v744_v62 = vpop.permute.xlu0 %743 }
 0x48a   : > { %v761_v0 = vsel %vm210_vm0, %v1859_v13, %v744_v62  ;;  %v1066_v13 = vld [vmem:[%s2490_s2 + $0x130] sm:$0xff]  ;;  %v1281_v62 = vld [vmem:[%s2490_s2 + $0x228] sm:$0xff] }
 0x48b   : > { %1018 = vrot.lane.b32.xlu2 %v761_v0, %s1735_s9  ;;  %v898_v1 = vsel %vm874_vm3, %v761_v0, 0.0  ;;  %v930_v2 = vsel %vm906_vm4, %v761_v0, 0.0  ;;  %1122 = vmatpush.msrb.mxu0 %v1066_v13  ;;  %v1280_v0 = vld [vmem:[%s2490_s2 + $0x220] sm:$0xff]  ;;  %v1278_v13 = vld [vmem:[%s2490_s2 + $0x210] sm:$0xff] }
 0x48c   : > { %v952_v3 = vrot.slane %v898_v1, 7  ;;  %v987_v10 = vrot.slane %v930_v2, 1  ;;  %v1045_v1 = vld [vmem:[%s2490_s2 + $0x88] sm:$0xff]  ;;  %v1044_v2 = vld [vmem:[%s2490_s2 + $0x80] sm:$0xff] }
 0x48d   : > { %1300 = vmatpush.msra.mxu0 %v1289_v40 }
 0x48e   : > { %v2189_v7 = vsel %vm975_vm5, %v985_v56, %v987_v10  ;;  %v2192_v8 = vsel %vm940_vm9, %v950_v46, %v952_v3  ;;  %v1053_v46 = vld [vmem:[%s2490_s2 + $0xc8] sm:$0xff]  ;;  %v1283_v56 = vld [vmem:[%s2490_s2 + $0x238] sm:$0xff] }
 0x48f   : > { %1549 = vmatmul.msk.f32.gmra.mxu3 %vm1031_vm6, %v2189_v7  ;;  %1560 = vmatmul.msk.f32.gmra.mxu1 %vm1031_vm6, %v2189_v7 }
 0x490   : > { %1301 = vmatpush.msra.mxu0 %v1288_v45  ;;  %v2418_v45 = vld [vmem:[%s2491_s3 + $0x5] ss:$0 sm:$0xff] }
 0x492   : > { %1302 = vmatpush.msra.mxu0 %v1287_v48 }
 0x4b5   : > { %v1007_v11 = vpop.permute.xlu1 %1006 }
 0x4b6   : > { %v2229_v26 = vsel %vm1031_vm6, %v965_v25, %v1007_v11 }
 0x4b7   : > { %1123 = vmatmul.f32.vlgmr.msrb.gmra.mxu0 %v2229_v26 }
 0x4bd   : > { %v1009_v28 = vpop.permute.xlu2 %1008  ;;  %v746_v43 = vpop.permute.xlu1 %745 }
 0x4be   : > { %v762_v44 = vsel %vm210_vm0, %v1867_v15, %v746_v43  ;;  %v2236_v38 = vsel %vm1031_vm6, %v2066_v6, %v1009_v28 }
 0x4bf   : > { %v899_v29 = vsel %vm875_vm7, %v762_v44, 0.0  ;;  %v931_v30 = vsel %vm907_vm8, %v762_v44, 0.0  ;;  %1126 = vmatmul.f32.gmra.mxu0 %v2236_v38  ;;  %v1626_v60 = vpack.i.bf16 0.0, %v762_v44 }
 0x4c0   : > { %v2239_v31 = vrot.slane %v899_v29, 7  ;;  %v989_v32 = vrot.slane %v931_v30, 1 }
 0x4c1   : > { %1627 = vrot.lane.b32.xlu1 %v1626_v60, %s1735_s9  ;;  %s2423_s9 = scalar_lea.vmem [#allocation2], %s1498_s14 }
 0x4c2   : > { %v990_v33 = vsel %vm975_vm5, %v987_v10, %v989_v32  ;;  %v2245_v14 = vsel %vm940_vm9, %v952_v3, %v2239_v31  ;;  %v2250_v15 = vsel %vm975_vm5, %v989_v32, 0.0  ;;  %v1043_v3 = vld [vmem:[%s2490_s2 + $0x78] sm:$0xff]  ;;  %v1736_v10 = vmov 0.0   ;;  %vm1552_vm5 = vmneg %vm1031_vm6  ;;  %s1429_s27 = sshll.u32 %s2423_s9, 4  ;;  %s1430_s27 = int_to_ptr.vmem [resolvable:$true] %s1429_s27 }
 0x4c3   : > { %1550 = vmatmul.msk.f32.gmra.mxu3 %vm1031_vm6, %v990_v33  ;;  %1561 = vmatmul.msk.f32.gmra.mxu1 %vm1031_vm6, %v990_v33  ;;  %v966_v22 = vsel %vm940_vm9, %v2239_v31, 0.0 }
 0x4cb   : > { %1551 = vmatmul.msk.f32.gmra.mxu3 %vm1031_vm6, %v2250_v15 }
 0x4cd   : > { %v1013_v37 = vpop.permute.xlu2 %1012 }
 0x4d3   : > { %1562 = vmatmul.msk.f32.vlgmr.msrb.gmra.mxu3 %vm1031_vm6, %v2088_v24  ;;  %v2270_v24 = vsel %vm1031_vm6, %v2122_v35, %v1013_v37 }
 0x4db   : > { %1563 = vmatmul.msk.f32.gmra.mxu3 %vm1031_vm6, %v2119_v34  ;;  %v1055_v34 = vld [vmem:[%s2490_s2 + $0xd8] sm:$0xff] }
 0x4dd   : > { %v1011_v6 = vpop.permute.xlu0 %1010 }
 0x4de   : > { %v2260_v36 = vsel %vm1031_vm6, %v2091_v12, %v1011_v6  ;;  %v1056_v12 = vld [vmem:[%s2490_s2 + $0xe0] sm:$0xff] }
 0x4df   : > { %1129 = vmatmul.f32.gmra.mxu0 %v2260_v36  ;;  %1193 = vmatpush.msra.mxu2 %v1056_v12 }
 0x4e1   : > { %1194 = vmatpush.msra.mxu2 %v1055_v34 }
 0x4e3   : > { %1564 = vmatmul.msk.f32.gmra.mxu3 %vm1031_vm6, %v2146_v5  ;;  %1195 = vmatpush.msra.mxu2 %v1054_v42  ;;  %v1286_v5 = vld [vmem:[%s2490_s2 + $0x250] sm:$0xff] }
 0x4e4   : > { %1303 = vmatpush.msra.mxu0 %v1286_v5 }
 0x4e5   : > { %v1017_v47 = vpop.permute.xlu0 %1016  ;;  %1196 = vmatpush.msra.mxu2 %v1053_v46  ;;  %v1019_v55 = vpop.permute.xlu2 %1018 }
 0x4e6   : > { %1304 = vmatpush.msra.mxu0 %v1285_v52 }
 0x4e7   : > { %1132 = vmatmul.f32.gmra.mxu0 %v2270_v24  ;;  %1197 = vmatpush.msra.mxu2 %v1052_v49 }
 0x4e9   : > { %1198 = vmatpush.msra.mxu2 %v1051_v51 }
 0x4ea   : > { %v1165_v25 = vpop.f32.mrf.mxu3 }
 0x4eb   : > { %1565 = vmatmul.msk.f32.gmra.mxu3 %vm1031_vm6, %v2173_v59  ;;  %1199 = vmatpush.msra.mxu2 %v1050_v53  ;;  %v1039_v59 = vsel %vm1031_vm6, %v2192_v8, %v1019_v55  ;;  %v1042_v8 = vld [vmem:[%s2490_s2 + $0x70] sm:$0xff] }
 0x4ed   : > { %v1015_v35 = vpop.permute.xlu1 %1014  ;;  %1200 = vmatpush.msra.mxu2 %v1049_v54 }
 0x4ee   : > { %v2286_v41 = vsel %vm1031_vm6, %v2149_v50, %v1015_v35  ;;  %v2311_v50 = vsel %vm1031_vm6, %v2152_v4, %v1017_v47  ;;  %v1284_v4 = vld [vmem:[%s2490_s2 + $0x240] sm:$0xff] }
 0x4ef   : > { %1135 = vmatmul.f32.gmra.mxu0 %v2286_v41  ;;  %1201 = vmatpush.msra.mxu2 %v1048_v57 }
 0x4f0   : > { %1305 = vmatpush.msra.mxu0 %v1284_v4 }
 0x4f1   : > { %1202 = vmatpush.msra.mxu2 %v1047_v61 }
 0x4f2   : > { %1306 = vmatpush.msra.mxu0 %v1283_v56 }
 0x4f3   : > { %1566 = vmatmul.msk.f32.gmra.mxu3 %vm1031_vm6, %v2189_v7  ;;  %1203 = vmatpush.msra.mxu2 %v1046_v63  ;;  %v1279_v7 = vld [vmem:[%s2490_s2 + $0x218] sm:$0xff] }
 0x4f4   : > { %1307 = vmatpush.msra.mxu0 %v1282_v58 }
 0x4f5   : > { %1204 = vmatpush.msra.mxu2 %v1045_v1 }
 0x4f6   : > { %1308 = vmatpush.msra.mxu0 %v1281_v62 }
 0x4f7   : > { %1138 = vmatmul.f32.gmra.mxu0 %v2311_v50  ;;  %1205 = vmatpush.msra.mxu2 %v1044_v2 }
 0x4f8   : > { %1309 = vmatpush.msra.mxu0 %v1280_v0 }
 0x4f9   : > { %1206 = vmatpush.msra.mxu2 %v1043_v3 }
 0x4fa   : > { %1310 = vmatpush.msra.mxu0 %v1279_v7 }
 0x4fb   : > { %1567 = vmatmul.msk.f32.gmra.mxu3 %vm1031_vm6, %v990_v33  ;;  %1207 = vmatpush.msra.mxu2 %v1042_v8 }
 0x4fc   : > { %1311 = vmatpush.msra.mxu0 %v1278_v13 }
 0x4fe   : > { %1312 = vmatpush.msra.mxu0 %v1277_v9 }
 0x4ff   : > { %1141 = vmatmul.f32.gmra.mxu0 %v1039_v59 }
 0x500   : > { %1313 = vmatpush.msra.mxu0 %v1276_v16 }
 0x502   : > { %1314 = vmatpush.msra.mxu0 %v1275_v17 }
 0x503   : > { %1568 = vmatmul.msk.f32.gmra.mxu3 %vm1031_vm6, %v2250_v15 }
 0x504   : > { %1315 = vmatpush.msra.mxu0 %v1274_v18 }
 0x50b   : > { %1378 = vmatmul.f32.gmra.mxu3 %v1736_v10 }
 0x533   : > { %v1628_v19 = vpop.permute.xlu1 %1627 }
 0x534   : > { %v1630_v20 = vunpack.i.h.bf16 %v1628_v19  ;;  %v1629_v21 = vunpack.i.l.bf16 %v1628_v19  ;;  %v1124_v27 = vpop.f32.mrf.mxu0 }
 0x535   : > { %v1166_v39 = vadd.f32 %v1165_v25, %v1124_v27 }
 0x536   : > { %1553 = vmatmul.msk.f32.vlgmr.msra.gmra.mxu2 %vm1552_vm5, %v1630_v20  ;;  %v1040_v23 = vsel %vm1031_vm6, %v2245_v14, %v1629_v21  ;;  %v1041_v11 = vsel %vm1031_vm6, %v966_v22, %v1630_v20 }
 0x537   : > { %1144 = vmatmul.f32.gmra.mxu0 %v1040_v23 }
 0x53c   : > { %v1127_v43 = vpop.f32.mrf.mxu0 }
 0x53e   : > { %1211 = vmatmul.f32.gmra.mxu2 %v2229_v26  ;;  %v1168_v26 = vpop.f32.mrf.mxu3 }
 0x53f   : > { %1316 = vmatmul.f32.vlgmr.msra.gmra.mxu0 %v2236_v38  ;;  %v1169_v47 = vadd.f32 %v1168_v26, %v1127_v43 }
 0x546   : > { %1214 = vmatmul.f32.gmra.mxu2 %v2236_v38  ;;  %v1171_v28 = vpop.f32.mrf.mxu3 }
 0x547   : > { %1319 = vmatmul.f32.gmra.mxu0 %v2260_v36 }
 0x54e   : > { %1217 = vmatmul.f32.gmra.mxu2 %v2260_v36  ;;  %v1174_v44 = vpop.f32.mrf.mxu3  ;;  %v1250_v36 = vpop.f32.mrf.mxu1 }
 0x54f   : > { %1322 = vmatmul.f32.gmra.mxu0 %v2270_v24 }
 0x556   : > { %1220 = vmatmul.f32.gmra.mxu2 %v2270_v24  ;;  %v1177_v29 = vpop.f32.mrf.mxu3  ;;  %v1253_v12 = vpop.f32.mrf.mxu1 }
 0x557   : > { %1325 = vmatmul.f32.gmra.mxu0 %v2286_v41 }
 0x55c   : > { %v1130_v38 = vpop.f32.mrf.mxu0 }
 0x55d   : > { %v1172_v56 = vadd.f32 %v1171_v28, %v1130_v38 }
 0x55e   : > { %1223 = vmatmul.f32.gmra.mxu2 %v2286_v41  ;;  %v2402_v60 = vpop.f32.mrf.mxu3  ;;  %v1256_v51 = vpop.f32.mrf.mxu1 }
 0x55f   : > { %1328 = vmatmul.f32.gmra.mxu0 %v2311_v50 }
 0x564   : > { %v1133_v30 = vpop.f32.mrf.mxu0 }
 0x565   : > { %v1175_v10 = vadd.f32 %v1174_v44, %v1133_v30 }
 0x566   : > { %1226 = vmatmul.f32.gmra.mxu2 %v2311_v50  ;;  %v2404_v32 = vpop.f32.mrf.mxu3  ;;  %v1259_v1 = vpop.f32.mrf.mxu1 }
 0x567   : > { %1331 = vmatmul.f32.gmra.mxu0 %v1039_v59 }
 0x56c   : > { %v1136_v31 = vpop.f32.mrf.mxu0 }
 0x56d   : > { %v1178_v22 = vadd.f32 %v1177_v29, %v1136_v31 }
 0x56e   : > { %1229 = vmatmul.f32.gmra.mxu2 %v1039_v59  ;;  %v2408_v14 = vpop.f32.mrf.mxu3  ;;  %v1262_v20 = vpop.f32.mrf.mxu1 }
 0x56f   : > { %1334 = vmatmul.f32.gmra.mxu0 %v1040_v23 }
 0x574   : > { %v2406_v33 = vpop.f32.mrf.mxu0 }
 0x575   : > { %v1181_v38 = vadd.f32 %v2402_v60, %v2406_v33 }
 0x576   : > { %v1358_v6 = vpop.f32.mrf.mxu3 }
 0x577   : > { %1337 = vmatmul.f32.gmra.mxu0 %v1041_v11 }
 0x57c   : > { %v2410_v15 = vpop.f32.mrf.mxu0 }
 0x57e   : > { %v1361_v24 = vpop.f32.mrf.mxu3 }
 0x586   : > { %v1364_v5 = vpop.f32.mrf.mxu3 }
 0x58e   : > { %v1367_v62 = vpop.f32.mrf.mxu3 }
 0x596   : > { %v1370_v19 = vpop.f32.mrf.mxu3 }
 0x59e   : > { %v1373_v30 = vpop.f32.mrf.mxu3 }
 0x5b4   : > { %v2412_v37 = vpop.f32.mrf.mxu0 }
 0x5b9   : > { %v1209_v34 = vpop.f32.mrf.mxu2 }
 0x5ba   : > { %v1210_v40 = vadd.f32 %v1209_v34, %v1166_v39 }
 0x5bc   : > { %v1251_v35 = vadd.f32 %v1250_v36, %v1210_v40  ;;  %v1317_v41 = vpop.f32.mrf.mxu0 }
 0x5bd   : > { %v1359_v42 = vadd.f32 %v1358_v6, %v1317_v41  ;;  %v1265_v6 = vpop.f32.mrf.mxu1  ;;  %v1376_v41 = vpop.f32.mrf.mxu3 }
 0x5bf   : > { %v1382_v46 = vadd.f32 %v1359_v42, %v1251_v35  ;;  %v1184_v35 = vadd.f32 %v2404_v32, %v2410_v15 }
 0x5c1   : > { %v1392_v48 = vadd.f32 %v2418_v45, %v1382_v46  ;;  %v1212_v49 = vpop.f32.mrf.mxu2 }
 0x5c2   : > { %v1213_v50 = vadd.f32 %v1212_v49, %v1169_v47 }
 0x5c3   : > { %v1400_v52 = vmax.f32 %v1392_v48, 0.0 }
 0x5c4   : > { %v1254_v53 = vadd.f32 %v1253_v12, %v1213_v50  ;;  %v1320_v4 = vpop.f32.mrf.mxu0 }
 0x5c5   : > { %1408 = vst.msk [vmem:[%s2423_s9] sm:$0xff] %vm210_vm0, %v1400_v52  ;;  %v1362_v54 = vadd.f32 %v1361_v24, %v1320_v4  ;;  %v1268_v46 = vpop.f32.mrf.mxu1 }
 0x5c7   : > { %v1383_v55 = vadd.f32 %v1362_v54, %v1254_v53  ;;  %v1379_v53 = vpop.f32.mrf.mxu3 }
 0x5c9   : > { %v1393_v57 = vadd.f32 %v2418_v45, %v1383_v55  ;;  %v1215_v58 = vpop.f32.mrf.mxu2 }
 0x5ca   : > { %v1216_v59 = vadd.f32 %v1215_v58, %v1172_v56 }
 0x5cb   : > { %v1401_v61 = vmax.f32 %v1393_v57, 0.0 }
 0x5cc   : > { %v1257_v63 = vadd.f32 %v1256_v51, %v1216_v59  ;;  %v1323_v0 = vpop.f32.mrf.mxu0  ;;  %v1187_v51 = vadd.f32 %v2408_v14, %v2412_v37 }
 0x5cd   : > { %1409 = vst.msk [vmem:[%s2423_s9 + $0x8] sm:$0xff] %vm210_vm0, %v1401_v61  ;;  %v1365_v2 = vadd.f32 %v1364_v5, %v1323_v0  ;;  %v1271_v4 = vpop.f32.mrf.mxu1 }
 0x5cf   : > { %v1384_v3 = vadd.f32 %v1365_v2, %v1257_v63 }
 0x5d1   : > { %v1394_v7 = vadd.f32 %v2418_v45, %v1384_v3  ;;  %v1218_v8 = vpop.f32.mrf.mxu2 }
 0x5d2   : > { %v1219_v13 = vadd.f32 %v1218_v8, %v1175_v10 }
 0x5d3   : > { %v1402_v9 = vmax.f32 %v1394_v7, 0.0 }
 0x5d4   : > { %v1260_v16 = vadd.f32 %v1259_v1, %v1219_v13  ;;  %v1326_v17 = vpop.f32.mrf.mxu0 }
 0x5d5   : > { %1410 = vst.msk [vmem:[%s2423_s9 + $0x10] sm:$0xff] %vm210_vm0, %v1402_v9  ;;  %v1368_v18 = vadd.f32 %v1367_v62, %v1326_v17 }
 0x5d7   : > { %v1385_v21 = vadd.f32 %v1368_v18, %v1260_v16 }
 0x5d9   : > { %v1395_v23 = vadd.f32 %v2418_v45, %v1385_v21  ;;  %v1221_v11 = vpop.f32.mrf.mxu2 }
 0x5da   : > { %v1222_v25 = vadd.f32 %v1221_v11, %v1178_v22 }
 0x5db   : > { %v1403_v26 = vmax.f32 %v1395_v23, 0.0 }
 0x5dc   : > { %v1263_v27 = vadd.f32 %v1262_v20, %v1222_v25  ;;  %v1329_v28 = vpop.f32.mrf.mxu0 }
 0x5dd   : > { %1411 = vst.msk [vmem:[%s2423_s9 + $0x18] sm:$0xff] %vm210_vm0, %v1403_v26  ;;  %v1371_v43 = vadd.f32 %v1370_v19, %v1329_v28 }
 0x5df   : > { %v1386_v44 = vadd.f32 %v1371_v43, %v1263_v27 }
 0x5e1   : > { %v1396_v36 = vadd.f32 %v2418_v45, %v1386_v44  ;;  %v1224_v29 = vpop.f32.mrf.mxu2 }
 0x5e2   : > { %v1225_v31 = vadd.f32 %v1224_v29, %v1181_v38 }
 0x5e3   : > { %v1404_v39 = vmax.f32 %v1396_v36, 0.0 }
 0x5e4   : > { %v1266_v24 = vadd.f32 %v1265_v6, %v1225_v31  ;;  %v1332_v12 = vpop.f32.mrf.mxu0 }
 0x5e5   : > { %1412 = vst.msk [vmem:[%s2423_s9 + $0x20] sm:$0xff] %vm210_vm0, %v1404_v39  ;;  %v1374_v34 = vadd.f32 %v1373_v30, %v1332_v12 }
 0x5e7   : > { %v1387_v40 = vadd.f32 %v1374_v34, %v1266_v24 }
 0x5e9   : > { %v1397_v60 = vadd.f32 %v2418_v45, %v1387_v40  ;;  %v1227_v33 = vpop.f32.mrf.mxu2 }
 0x5ea   : > { %v1228_v42 = vadd.f32 %v1227_v33, %v1184_v35 }
 0x5eb   : > { %v1405_v47 = vmax.f32 %v1397_v60, 0.0 }
 0x5ec   : > { %v1269_v48 = vadd.f32 %v1268_v46, %v1228_v42  ;;  %v1335_v49 = vpop.f32.mrf.mxu0 }
 0x5ed   : > { %1413 = vst.msk [vmem:[%s2423_s9 + $0x28] sm:$0xff] %vm210_vm0, %v1405_v47  ;;  %v1377_v5 = vadd.f32 %v1376_v41, %v1335_v49 }
 0x5ef   : > { %v1388_v50 = vadd.f32 %v1377_v5, %v1269_v48 }
 0x5f1   : > { %v1398_v32 = vadd.f32 %v2418_v45, %v1388_v50  ;;  %v1230_v15 = vpop.f32.mrf.mxu2 }
 0x5f2   : > { %v1231_v52 = vadd.f32 %v1230_v15, %v1187_v51 }
 0x5f3   : > { %v1406_v54 = vmax.f32 %v1398_v32, 0.0 }
 0x5f4   : > { %v1272_v55 = vadd.f32 %v1271_v4, %v1231_v52  ;;  %v1338_v56 = vpop.f32.mrf.mxu0 }
 0x5f5   : > { %1414 = vst.msk [vmem:[%s2423_s9 + $0x30] sm:$0xff] %vm210_vm0, %v1406_v54  ;;  %v1380_v14 = vadd.f32 %v1379_v53, %v1338_v56 }
 0x5f7   : > { %v1389_v37 = vadd.f32 %v1380_v14, %v1272_v55 }
 0x5f9   : > { %v1399_v57 = vadd.f32 %v2418_v45, %v1389_v37 }
 0x5fb   : > { %v1407_v58 = vmax.f32 %v1399_v57, 0.0 }
 0x5fd   : > { %1415 = vst.msk [vmem:[%s2423_s9 + $0x38] sm:$0xff] %vm210_vm0, %v1407_v58 }
 0x5fe   : > { %1696 = shalt.err (!%p1693_p3)
}
 0x5ff   : > { %s1737_s10 = smov 128   ;;  %s1738_s12 = smov 8  }
 0x600   : > { %1581 = dma.vmem_to_hbm [thread:$0]  (%p1802_p5), %s1430_s27, 1024, %s1432_s28, %s1417_s19, %s1737_s10, %s1737_s10, %s1738_s12  }
 0x601 PF: > { %p1587_p4 = scmp.ge.s32.totalorder %s1731_s18, 2  ;;  %s1446_s14 = sand.u32 1, %s1719_s15  }
 0x602   : > { %s1447_s9 = scalar_lea.sflag [#allocation3], %s1446_s14 }
 0x603   : > { %p1584_p7 = pnand %p1587_p4, %p1806_p6 }
 0x605   : > { %p1585_p8 = pneg %p1584_p7 }
 0x607   : > { %1714 = dma.done.wait (%p1585_p8), %s1447_s9, 1024  }
 0x608   : > { %1716 = vsyncadd (%p1585_p8), %s1447_s9, 4294966272  ;;  %p14_p9 = scmp.ge.s32.totalorder %s1789_s21, 4   ;;  %s2499_s15 = smov %s1723_s16 }
 0x609   : > { %s2500_s16 = smov %s1727_s17  ;;  %s2501_s17 = smov %s1800_s24 }
 0x60a   : > { %s2502_s18 = smov %s1789_s21  ;;  %16 = sbr.rel (!%p14_p9) target bundleno = 3 (0x3), region = 71 }
 0x60f   :  { %1453 = vsyncpa [#allocation3], 1 }
 0x610   :  { %1455 = vsyncpa [#allocation3 + $0x1], 1 }

</bundles_post_ra>
